<compile_context>
chip_gen: v5e
topology: v5e:2x2
jax: 0.10.0
libtpu: 0.0.40
codegen_flags: <defaults>
</compile_context>

<pallas_src>
import collections
import functools

import jax
import jax.numpy as jnp
from jax.experimental import pallas as pl
from jax.experimental.pallas import tpu as pltpu


LANE = 128  # lane-dense padding width for the logits output slab

Plan = collections.namedtuple("Plan", ["order", "base", "n_nodes"])


# --------------------------- trace-time planner ----------------------------

def plan_layout(n_nodes, leaf_rows, levels):
    """Top-down node renumbering so per-level gathers/scatters are contiguous.

    order[k] : original node ids of level k (k=0: leaves) in layout order.
               For k >= 1, level k-1's layout order is exactly
               [left children of order[k]... , right children of order[k]...],
               so gathering h_l / h_r for level k is two contiguous slices and
               scattering level k's results is one contiguous slice.
    base[k]  : first per-tree layout row of level k.
    """
    level_nodes = [list(leaf_rows)] + [list(nr) for nr, _ in levels]
    child_of = {}
    for node_rows, child_pairs in levels:
        for n, (l, r) in zip(node_rows, child_pairs):
            child_of[n] = (l, r)

    K = len(level_nodes) - 1
    order = [None] * (K + 1)
    order[K] = tuple(level_nodes[K])
    for k in range(K, 0, -1):
        lefts = [child_of[n][0] for n in order[k]]
        rights = [child_of[n][1] for n in order[k]]
        # TODO(synk): general SST trees draw children from several earlier
        # levels; that case needs strided loads or per-tree padding instead.
        assert set(lefts + rights) == set(level_nodes[k - 1]), (
            "planner assumes each level's children are exactly the previous level")
        order[k - 1] = tuple(lefts + rights)

    base, acc = [], 0
    for k in range(K + 1):
        base.append(acc)
        acc += len(order[k])
    assert acc == n_nodes
    return Plan(order=tuple(order), base=tuple(base), n_nodes=n_nodes)


# ------------------------------ fused kernel -------------------------------

def make_tree_lstm_kernel(level_desc, n_leaf_rows, x_size, h_size):
    """level_desc: static tuple of (dst_row, src_row, rows) in scratch rows."""
    hs, x = h_size, x_size

    def kernel(emb_ref, w_ref, b_ref, out_ref, h_st, c_st):
        # ---- packed weight slab views (static slices, loaded once) ----
        w_iou_t = w_ref[0:x, 0:3 * hs]                    # (x, 3h)
        u_l     = w_ref[x:x + hs, 0:5 * hs]               # (h, 5h) left-child rows
        u_r     = w_ref[x + hs:x + 2 * hs, 0:5 * hs]      # (h, 5h) right-child rows
        w_lin_t = w_ref[x + 2 * hs:x + 3 * hs, 0:LANE]    # (h, 128) zero-padded
        b_iou   = b_ref[0:1, 0:3 * hs]
        b_fiou  = b_ref[1:2, 0:5 * hs]
        b_lin   = b_ref[2:3, 0:LANE]

        # ---- leaf phase (mask already folded into embeds; c0 == 0) ----
        iou = jnp.dot(emb_ref[...], w_iou_t,
                      preferred_element_type=jnp.float32) + b_iou
        sg = jax.nn.sigmoid(iou[:, 0:2 * hs])             # i | o : one EUP push
        i = sg[:, 0:hs]
        o = sg[:, hs:2 * hs]
        u = jnp.tanh(iou[:, 2 * hs:3 * hs])
        c_leaf = i * u                                    # + c0, with c0 == 0
        h_leaf = o * jnp.tanh(c_leaf)
        h_st[0:n_leaf_rows, :] = h_leaf
        c_st[0:n_leaf_rows, :] = c_leaf

        # ---- internal levels: contiguous block gathers / scatters ----
        for dst, src, rows in level_desc:
            h_l = h_st[src:src + rows, :]
            h_r = h_st[src + rows:src + 2 * rows, :]
            c_l = c_st[src:src + rows, :]
            c_r = c_st[src + rows:src + 2 * rows, :]

            pre = (jnp.dot(h_l, u_l, preferred_element_type=jnp.float32)
                   + jnp.dot(h_r, u_r, preferred_element_type=jnp.float32)
                   + b_fiou)                              # (rows, 5h) = [f_l f_r i o | u]

            sg = jax.nn.sigmoid(pre[:, 0:4 * hs])         # one lane tile at h=32
            f_l = sg[:, 0:hs]
            f_r = sg[:, hs:2 * hs]
            i2  = sg[:, 2 * hs:3 * hs]
            o2  = sg[:, 3 * hs:4 * hs]
            u2  = jnp.tanh(pre[:, 4 * hs:5 * hs])

            c_new = i2 * u2 + f_l * c_l + f_r * c_r
            h_new = o2 * jnp.tanh(c_new)
            h_st[dst:dst + rows, :] = h_new
            c_st[dst:dst + rows, :] = c_new

        # ---- classifier: lane-dense (padded to 128) store ----
        out_ref[...] = jnp.dot(h_st[...], w_lin_t,
                               preferred_element_type=jnp.float32) + b_lin

    return kernel


# ------------------------------ param packing ------------------------------

def prepare_tree_lstm_params(raw, num_classes):
    """Pack all weights/biases into two lane-padded, VMEM-resident slabs."""
    h = raw["b_iou"].shape[-1] // 3
    x = raw["W_iou"].shape[-1]
    cols = max(5 * h, LANE)
    u_fiou_t = jnp.concatenate([raw["U_f"].T, raw["U_iou"].T], axis=1)   # (2h, 5h)

    w_slab = jnp.zeros((x + 3 * h, cols), jnp.float32)
    w_slab = w_slab.at[0:x, 0:3 * h].set(raw["W_iou"].T)
    w_slab = w_slab.at[x:x + h, 0:5 * h].set(u_fiou_t[:h])
    w_slab = w_slab.at[x + h:x + 2 * h, 0:5 * h].set(u_fiou_t[h:])
    w_slab = w_slab.at[x + 2 * h:x + 3 * h, 0:num_classes].set(raw["W_lin"].T)

    b_slab = jnp.zeros((3, cols), jnp.float32)
    b_slab = b_slab.at[0, 0:3 * h].set(raw["b_iou"][0])
    b_slab = b_slab.at[1, 0:2 * h].set(raw["b_f"])
    b_slab = b_slab.at[1, 2 * h:5 * h].set(raw["b_iou"][0])
    b_slab = b_slab.at[2, 0:num_classes].set(raw["b_lin"])
    return {"emb": raw["emb"], "W_slab": w_slab, "B_slab": b_slab}


# ------------------------------ call wrapper -------------------------------

@functools.partial(jax.jit,
                   static_argnames=("plan", "num_classes", "trees_per_step"))
def tree_lstm_forward(prep, tokens, mask, *, plan, num_classes, trees_per_step):
    """Batched TreeLSTM forward.  tokens/mask: (B, N).  Returns (B, N, C).

    TODO(synk): initial h/c are assumed zero (standard SST usage).  A non-zero
    initial state would need the h0/c0 input DMAs and the leaf `+ c_prev` back.
    """
    B, N = tokens.shape
    TB = trees_per_step
    assert B % TB == 0 and N == plan.n_nodes
    steps = B // TB
    x_size = prep["emb"].shape[-1]
    h_size = (prep["W_slab"].shape[0] - x_size) // 3
    order, base = plan.order, plan.base
    n_leaf = len(order[0])

    # static per-level descriptors (dst, src, rows) in scratch rows
    level_desc = tuple(
        (TB * base[k], TB * base[k - 1], TB * len(order[k]))
        for k in range(1, len(order)))

    # leaf embeddings in kernel layout order (node-position major, tree minor),
    # with the word mask pre-multiplied (linear, exact).  Dropout = identity.
    leaf_ids = jnp.asarray(order[0], jnp.int32)
    tok_leaf = tokens[:, leaf_ids].reshape(steps, TB, n_leaf)
    msk_leaf = mask[:, leaf_ids].reshape(steps, TB, n_leaf).astype(jnp.float32)
    tok_lay = tok_leaf.transpose(0, 2, 1).reshape(steps * n_leaf * TB)
    msk_lay = msk_leaf.transpose(0, 2, 1).reshape(steps * n_leaf * TB)
    embeds = jnp.take(prep["emb"], tok_lay, axis=0) * msk_lay[:, None]   # (B*n_leaf, x)

    kernel = make_tree_lstm_kernel(level_desc, TB * n_leaf, x_size, h_size)

    out_flat = pl.pallas_call(
        kernel,
        grid=(steps,),
        in_specs=[
            pl.BlockSpec((TB * n_leaf, x_size), lambda s: (s, 0)),
            pl.BlockSpec(prep["W_slab"].shape, lambda s: (0, 0)),   # VMEM-resident
            pl.BlockSpec(prep["B_slab"].shape, lambda s: (0, 0)),   # VMEM-resident
        ],
        out_specs=pl.BlockSpec((TB * N, LANE), lambda s: (s, 0)),
        out_shape=jax.ShapeDtypeStruct((B * N, LANE), jnp.float32),
        scratch_shapes=[pltpu.VMEM((TB * N, h_size), jnp.float32),   # h state
                        pltpu.VMEM((TB * N, h_size), jnp.float32)],  # c state
        compiler_params=pltpu.CompilerParams(
            dimension_semantics=("parallel",),
            vmem_limit_bytes=32 * 1024 * 1024),
    )(embeds, prep["W_slab"], prep["B_slab"])

    # un-permute: layout rows -> (tree, original node id)
    pos = {}
    for k in range(len(order)):
        for j, v in enumerate(order[k]):
            pos[v] = base[k] + j
    rowidx = jnp.asarray(
        [[(b // TB) * (TB * N) + pos[v] * TB + (b % TB) for v in range(N)]
         for b in range(B)], jnp.int32)
    return out_flat[rowidx][:, :, :num_classes]


# ------------------------------ reference (plain JAX) ----------------------

def tree_lstm_reference(raw, tokens_1, mask_1, leaf_rows, levels):
    """Single-tree reference with zero initial h/c, original node numbering."""
    h_size = raw["b_iou"].shape[-1] // 3
    N = tokens_1.shape[0]
    embeds = jnp.take(raw["emb"], tokens_1, axis=0)
    iou_all = (embeds @ raw["W_iou"].T) * mask_1[:, None]
    h_all = jnp.zeros((N, h_size), jnp.float32)
    c_all = jnp.zeros((N, h_size), jnp.float32)
    leaf_idx = jnp.asarray(leaf_rows)

    def gates(iou):
        return (jax.nn.sigmoid(iou[:, :h_size]),
                jax.nn.sigmoid(iou[:, h_size:2 * h_size]),
                jnp.tanh(iou[:, 2 * h_size:]))

    i, o, u = gates(iou_all[leaf_idx] + raw["b_iou"])
    c_leaf = i * u + c_all[leaf_idx]
    h_all = h_all.at[leaf_idx].set(o * jnp.tanh(c_leaf))
    c_all = c_all.at[leaf_idx].set(c_leaf)

    for node_rows, child_pairs in levels:
        node_idx = jnp.asarray(node_rows)
        child_idx = jnp.asarray(child_pairs)
        n = node_idx.shape[0]
        h_cat = h_all[child_idx].reshape(n, 2 * h_size)
        f = jax.nn.sigmoid(h_cat @ raw["U_f"].T + raw["b_f"])
        c_red = jnp.sum(f.reshape(n, 2, h_size) * c_all[child_idx], axis=1)
        i, o, u = gates(h_cat @ raw["U_iou"].T + raw["b_iou"])
        c_new = i * u + c_red
        h_all = h_all.at[node_idx].set(o * jnp.tanh(c_new))
        c_all = c_all.at[node_idx].set(c_new)

    return h_all @ raw["W_lin"].T + raw["b_lin"]


# ---------------------------------- main -----------------------------------

if __name__ == "__main__":
    key = jax.random.PRNGKey(0)
    num_vocabs, x_size, h_size, num_classes = 100, 128, 32, 5

    # Fixed complete binary tree: 8 leaves (nodes 0..7), internal 8..14 (root 14).
    N, n_leaves = 15, 8
    leaf_rows = tuple(range(n_leaves))
    levels = (
        ((8, 9, 10, 11), ((0, 1), (2, 3), (4, 5), (6, 7))),
        ((12, 13), ((8, 9), (10, 11))),
        ((14,), ((12, 13),)),
    )
    plan = plan_layout(N, leaf_rows, levels)

    B, TB = 32, 8   # 32 trees, 8 trees per grid step -> grid=(4,) "parallel"

    ks = jax.random.split(key, 8)
    raw = {
        "emb":   jax.random.normal(ks[0], (num_vocabs, x_size), jnp.float32) * 0.1,
        "W_iou": jax.random.normal(ks[1], (3 * h_size, x_size), jnp.float32) * 0.1,
        "U_iou": jax.random.normal(ks[2], (3 * h_size, 2 * h_size), jnp.float32) * 0.1,
        "b_iou": jnp.zeros((1, 3 * h_size), jnp.float32),
        "U_f":   jax.random.normal(ks[3], (2 * h_size, 2 * h_size), jnp.float32) * 0.1,
        "b_f":   jax.random.normal(ks[4], (2 * h_size,), jnp.float32) * 0.1,
        "W_lin": jax.random.normal(ks[5], (num_classes, h_size), jnp.float32) * 0.1,
        "b_lin": jax.random.normal(ks[6], (num_classes,), jnp.float32) * 0.1,
    }

    tokens = jax.random.randint(ks[7], (B, N), 0, num_vocabs)
    # SST convention: leaves carry words (mask=1), internal nodes mask=0.
    mask_1 = jnp.concatenate(
        [jnp.ones((n_leaves,), jnp.float32), jnp.zeros((N - n_leaves,), jnp.float32)])
    mask = jnp.tile(mask_1[None, :], (B, 1))

    prep = prepare_tree_lstm_params(raw, num_classes)
    logits = tree_lstm_forward(prep, tokens, mask, plan=plan,
                               num_classes=num_classes, trees_per_step=TB)
    logits = jax.block_until_ready(logits)

    ref = jax.vmap(
        lambda t, m: tree_lstm_reference(raw, t, m, leaf_rows, levels))(tokens, mask)

    assert logits.shape == (B, N, num_classes)
    assert jnp.allclose(logits, ref, atol=1e-5, rtol=1e-5)

    print("KERNEL_OK")
</pallas_src>

<mosaic_0001>
module attributes {stable_mosaic.version = 11 : i64} {
  func.func @kernel(%arg0: i32, %arg1: memref<64x128xf32, #tpu.memory_space<vmem>>, %arg2: memref<224x160xf32, #tpu.memory_space<vmem>>, %arg3: memref<3x160xf32, #tpu.memory_space<vmem>>, %arg4: memref<120x128xf32, #tpu.memory_space<vmem>>, %arg5: memref<120x32xf32, #tpu.memory_space<vmem>>, %arg6: memref<120x32xf32, #tpu.memory_space<vmem>>) attributes {dimension_semantics = [#tpu.dimension_semantics<parallel>], iteration_bounds = array<i64: 4>, scalar_prefetch = 0 : i64, scratch_operands = 2 : i64, tpu.core_type = #tpu.core_type<tc>, window_params = [{transform_indices = @transform_0, window_bounds = array<i64: 64, 128>}, {pipeline_mode = #tpu.pipeline_mode<synchronous>, transform_indices = @transform_1, window_bounds = array<i64: 224, 160>}, {pipeline_mode = #tpu.pipeline_mode<synchronous>, transform_indices = @transform_2, window_bounds = array<i64: 3, 160>}, {transform_indices = @transform_3, window_bounds = array<i64: 120, 128>}]} {
    %c0 = arith.constant 0 : index
    %c0_0 = arith.constant 0 : index
    %0 = vector.load %arg2[%c0, %c0_0] : memref<224x160xf32, #tpu.memory_space<vmem>>, vector<128x96xf32>
    %c128 = arith.constant 128 : index
    %c0_1 = arith.constant 0 : index
    %1 = vector.load %arg2[%c128, %c0_1] : memref<224x160xf32, #tpu.memory_space<vmem>>, vector<32x160xf32>
    %c160 = arith.constant 160 : index
    %c0_2 = arith.constant 0 : index
    %2 = vector.load %arg2[%c160, %c0_2] : memref<224x160xf32, #tpu.memory_space<vmem>>, vector<32x160xf32>
    %c192 = arith.constant 192 : index
    %c0_3 = arith.constant 0 : index
    %3 = vector.load %arg2[%c192, %c0_3] : memref<224x160xf32, #tpu.memory_space<vmem>>, vector<32x128xf32>
    %c0_4 = arith.constant 0 : index
    %c0_5 = arith.constant 0 : index
    %4 = vector.load %arg3[%c0_4, %c0_5] : memref<3x160xf32, #tpu.memory_space<vmem>>, vector<1x96xf32>
    %c1 = arith.constant 1 : index
    %c0_6 = arith.constant 0 : index
    %5 = vector.load %arg3[%c1, %c0_6] : memref<3x160xf32, #tpu.memory_space<vmem>>, vector<1x160xf32>
    %c2 = arith.constant 2 : index
    %c0_7 = arith.constant 0 : index
    %6 = vector.load %arg3[%c2, %c0_7] : memref<3x160xf32, #tpu.memory_space<vmem>>, vector<1x128xf32>
    %c0_8 = arith.constant 0 : index
    %c0_9 = arith.constant 0 : index
    %7 = vector.load %arg1[%c0_8, %c0_9] : memref<64x128xf32, #tpu.memory_space<vmem>>, vector<64x128xf32>
    %cst = arith.constant dense<0.000000e+00> : vector<64x96xf32>
    %8 = tpu.matmul %7, %0, %cst {dimension_numbers = #tpu.dot_dimension_numbers<[1], [0], [0], [1], [0, 0, 1, 1], [], []>} : vector<64x128xf32>, vector<128x96xf32>, vector<64x96xf32> -> vector<64x96xf32>
    %9 = vector.broadcast %4 : vector<1x96xf32> to vector<64x96xf32>
    %10 = arith.addf %8, %9 : vector<64x96xf32>
    %11 = vector.extract_strided_slice %10 {offsets = [0, 0], sizes = [64, 64], strides = [1, 1]} : vector<64x96xf32> to vector<64x64xf32>
    %12 = arith.negf %11 : vector<64x64xf32>
    %13 = math.exp %12 : vector<64x64xf32>
    %cst_10 = arith.constant 1.000000e+00 : f32
    %14 = vector.broadcast %cst_10 : f32 to vector<64x64xf32>
    %15 = arith.addf %14, %13 : vector<64x64xf32>
    %16 = arith.divf %14, %15 : vector<64x64xf32>
    %17 = vector.extract_strided_slice %16 {offsets = [0, 0], sizes = [64, 32], strides = [1, 1]} : vector<64x64xf32> to vector<64x32xf32>
    %18 = vector.extract_strided_slice %16 {offsets = [0, 32], sizes = [64, 32], strides = [1, 1]} : vector<64x64xf32> to vector<64x32xf32>
    %19 = vector.extract_strided_slice %10 {offsets = [0, 64], sizes = [64, 32], strides = [1, 1]} : vector<64x96xf32> to vector<64x32xf32>
    %20 = math.tanh %19 : vector<64x32xf32>
    %21 = arith.mulf %17, %20 : vector<64x32xf32>
    %22 = math.tanh %21 : vector<64x32xf32>
    %23 = arith.mulf %18, %22 : vector<64x32xf32>
    %c0_11 = arith.constant 0 : index
    %c0_12 = arith.constant 0 : index
    %24 = vector.load %arg5[%c0_11, %c0_12] : memref<120x32xf32, #tpu.memory_space<vmem>>, vector<64x32xf32>
    tpu.vector_store %arg5[%c0_11, %c0_12], %23 {strides = array<i32>} : memref<120x32xf32, #tpu.memory_space<vmem>>, vector<64x32xf32>,
    %c0_13 = arith.constant 0 : index
    %c0_14 = arith.constant 0 : index
    %25 = vector.load %arg6[%c0_13, %c0_14] : memref<120x32xf32, #tpu.memory_space<vmem>>, vector<64x32xf32>
    tpu.vector_store %arg6[%c0_13, %c0_14], %21 {strides = array<i32>} : memref<120x32xf32, #tpu.memory_space<vmem>>, vector<64x32xf32>,
    %c0_15 = arith.constant 0 : index
    %c0_16 = arith.constant 0 : index
    %26 = vector.load %arg5[%c0_15, %c0_16] : memref<120x32xf32, #tpu.memory_space<vmem>>, vector<32x32xf32>
    %c32 = arith.constant 32 : index
    %c0_17 = arith.constant 0 : index
    %27 = vector.load %arg5[%c32, %c0_17] : memref<120x32xf32, #tpu.memory_space<vmem>>, vector<32x32xf32>
    %c0_18 = arith.constant 0 : index
    %c0_19 = arith.constant 0 : index
    %28 = vector.load %arg6[%c0_18, %c0_19] : memref<120x32xf32, #tpu.memory_space<vmem>>, vector<32x32xf32>
    %c32_20 = arith.constant 32 : index
    %c0_21 = arith.constant 0 : index
    %29 = vector.load %arg6[%c32_20, %c0_21] : memref<120x32xf32, #tpu.memory_space<vmem>>, vector<32x32xf32>
    %cst_22 = arith.constant dense<0.000000e+00> : vector<32x160xf32>
    %30 = tpu.matmul %26, %1, %cst_22 {dimension_numbers = #tpu.dot_dimension_numbers<[1], [0], [0], [1], [0, 0, 1, 1], [], []>} : vector<32x32xf32>, vector<32x160xf32>, vector<32x160xf32> -> vector<32x160xf32>
    %cst_23 = arith.constant dense<0.000000e+00> : vector<32x160xf32>
    %31 = tpu.matmul %27, %2, %cst_23 {dimension_numbers = #tpu.dot_dimension_numbers<[1], [0], [0], [1], [0, 0, 1, 1], [], []>} : vector<32x32xf32>, vector<32x160xf32>, vector<32x160xf32> -> vector<32x160xf32>
    %32 = arith.addf %30, %31 : vector<32x160xf32>
    %33 = vector.broadcast %5 : vector<1x160xf32> to vector<32x160xf32>
    %34 = arith.addf %32, %33 : vector<32x160xf32>
    %35 = vector.extract_strided_slice %34 {offsets = [0, 0], sizes = [32, 128], strides = [1, 1]} : vector<32x160xf32> to vector<32x128xf32>
    %36 = arith.negf %35 : vector<32x128xf32>
    %37 = math.exp %36 : vector<32x128xf32>
    %cst_24 = arith.constant 1.000000e+00 : f32
    %38 = vector.broadcast %cst_24 : f32 to vector<32x128xf32>
    %39 = arith.addf %38, %37 : vector<32x128xf32>
    %40 = arith.divf %38, %39 : vector<32x128xf32>
    %41 = vector.extract_strided_slice %40 {offsets = [0, 0], sizes = [32, 32], strides = [1, 1]} : vector<32x128xf32> to vector<32x32xf32>
    %42 = vector.extract_strided_slice %40 {offsets = [0, 32], sizes = [32, 32], strides = [1, 1]} : vector<32x128xf32> to vector<32x32xf32>
    %43 = vector.extract_strided_slice %40 {offsets = [0, 64], sizes = [32, 32], strides = [1, 1]} : vector<32x128xf32> to vector<32x32xf32>
    %44 = vector.extract_strided_slice %40 {offsets = [0, 96], sizes = [32, 32], strides = [1, 1]} : vector<32x128xf32> to vector<32x32xf32>
    %45 = vector.extract_strided_slice %34 {offsets = [0, 128], sizes = [32, 32], strides = [1, 1]} : vector<32x160xf32> to vector<32x32xf32>
    %46 = math.tanh %45 : vector<32x32xf32>
    %47 = arith.mulf %43, %46 : vector<32x32xf32>
    %48 = arith.mulf %41, %28 : vector<32x32xf32>
    %49 = arith.addf %47, %48 : vector<32x32xf32>
    %50 = arith.mulf %42, %29 : vector<32x32xf32>
    %51 = arith.addf %49, %50 : vector<32x32xf32>
    %52 = math.tanh %51 : vector<32x32xf32>
    %53 = arith.mulf %44, %52 : vector<32x32xf32>
    %c64 = arith.constant 64 : index
    %c0_25 = arith.constant 0 : index
    %54 = vector.load %arg5[%c64, %c0_25] : memref<120x32xf32, #tpu.memory_space<vmem>>, vector<32x32xf32>
    tpu.vector_store %arg5[%c64, %c0_25], %53 {strides = array<i32>} : memref<120x32xf32, #tpu.memory_space<vmem>>, vector<32x32xf32>,
    %c64_26 = arith.constant 64 : index
    %c0_27 = arith.constant 0 : index
    %55 = vector.load %arg6[%c64_26, %c0_27] : memref<120x32xf32, #tpu.memory_space<vmem>>, vector<32x32xf32>
    tpu.vector_store %arg6[%c64_26, %c0_27], %51 {strides = array<i32>} : memref<120x32xf32, #tpu.memory_space<vmem>>, vector<32x32xf32>,
    %c64_28 = arith.constant 64 : index
    %c0_29 = arith.constant 0 : index
    %56 = vector.load %arg5[%c64_28, %c0_29] : memref<120x32xf32, #tpu.memory_space<vmem>>, vector<16x32xf32>
    %c80 = arith.constant 80 : index
    %c0_30 = arith.constant 0 : index
    %57 = vector.load %arg5[%c80, %c0_30] : memref<120x32xf32, #tpu.memory_space<vmem>>, vector<16x32xf32>
    %c64_31 = arith.constant 64 : index
    %c0_32 = arith.constant 0 : index
    %58 = vector.load %arg6[%c64_31, %c0_32] : memref<120x32xf32, #tpu.memory_space<vmem>>, vector<16x32xf32>
    %c80_33 = arith.constant 80 : index
    %c0_34 = arith.constant 0 : index
    %59 = vector.load %arg6[%c80_33, %c0_34] : memref<120x32xf32, #tpu.memory_space<vmem>>, vector<16x32xf32>
    %cst_35 = arith.constant dense<0.000000e+00> : vector<16x160xf32>
    %60 = tpu.matmul %56, %1, %cst_35 {dimension_numbers = #tpu.dot_dimension_numbers<[1], [0], [0], [1], [0, 0, 1, 1], [], []>} : vector<16x32xf32>, vector<32x160xf32>, vector<16x160xf32> -> vector<16x160xf32>
    %cst_36 = arith.constant dense<0.000000e+00> : vector<16x160xf32>
    %61 = tpu.matmul %57, %2, %cst_36 {dimension_numbers = #tpu.dot_dimension_numbers<[1], [0], [0], [1], [0, 0, 1, 1], [], []>} : vector<16x32xf32>, vector<32x160xf32>, vector<16x160xf32> -> vector<16x160xf32>
    %62 = arith.addf %60, %61 : vector<16x160xf32>
    %63 = vector.broadcast %5 : vector<1x160xf32> to vector<16x160xf32>
    %64 = arith.addf %62, %63 : vector<16x160xf32>
    %65 = vector.extract_strided_slice %64 {offsets = [0, 0], sizes = [16, 128], strides = [1, 1]} : vector<16x160xf32> to vector<16x128xf32>
    %66 = arith.negf %65 : vector<16x128xf32>
    %67 = math.exp %66 : vector<16x128xf32>
    %cst_37 = arith.constant 1.000000e+00 : f32
    %68 = vector.broadcast %cst_37 : f32 to vector<16x128xf32>
    %69 = arith.addf %68, %67 : vector<16x128xf32>
    %70 = arith.divf %68, %69 : vector<16x128xf32>
    %71 = vector.extract_strided_slice %70 {offsets = [0, 0], sizes = [16, 32], strides = [1, 1]} : vector<16x128xf32> to vector<16x32xf32>
    %72 = vector.extract_strided_slice %70 {offsets = [0, 32], sizes = [16, 32], strides = [1, 1]} : vector<16x128xf32> to vector<16x32xf32>
    %73 = vector.extract_strided_slice %70 {offsets = [0, 64], sizes = [16, 32], strides = [1, 1]} : vector<16x128xf32> to vector<16x32xf32>
    %74 = vector.extract_strided_slice %70 {offsets = [0, 96], sizes = [16, 32], strides = [1, 1]} : vector<16x128xf32> to vector<16x32xf32>
    %75 = vector.extract_strided_slice %64 {offsets = [0, 128], sizes = [16, 32], strides = [1, 1]} : vector<16x160xf32> to vector<16x32xf32>
    %76 = math.tanh %75 : vector<16x32xf32>
    %77 = arith.mulf %73, %76 : vector<16x32xf32>
    %78 = arith.mulf %71, %58 : vector<16x32xf32>
    %79 = arith.addf %77, %78 : vector<16x32xf32>
    %80 = arith.mulf %72, %59 : vector<16x32xf32>
    %81 = arith.addf %79, %80 : vector<16x32xf32>
    %82 = math.tanh %81 : vector<16x32xf32>
    %83 = arith.mulf %74, %82 : vector<16x32xf32>
    %c96 = arith.constant 96 : index
    %c0_38 = arith.constant 0 : index
    %84 = vector.load %arg5[%c96, %c0_38] : memref<120x32xf32, #tpu.memory_space<vmem>>, vector<16x32xf32>
    tpu.vector_store %arg5[%c96, %c0_38], %83 {strides = array<i32>} : memref<120x32xf32, #tpu.memory_space<vmem>>, vector<16x32xf32>,
    %c96_39 = arith.constant 96 : index
    %c0_40 = arith.constant 0 : index
    %85 = vector.load %arg6[%c96_39, %c0_40] : memref<120x32xf32, #tpu.memory_space<vmem>>, vector<16x32xf32>
    tpu.vector_store %arg6[%c96_39, %c0_40], %81 {strides = array<i32>} : memref<120x32xf32, #tpu.memory_space<vmem>>, vector<16x32xf32>,
    %c96_41 = arith.constant 96 : index
    %c0_42 = arith.constant 0 : index
    %86 = vector.load %arg5[%c96_41, %c0_42] : memref<120x32xf32, #tpu.memory_space<vmem>>, vector<8x32xf32>
    %c104 = arith.constant 104 : index
    %c0_43 = arith.constant 0 : index
    %87 = vector.load %arg5[%c104, %c0_43] : memref<120x32xf32, #tpu.memory_space<vmem>>, vector<8x32xf32>
    %c96_44 = arith.constant 96 : index
    %c0_45 = arith.constant 0 : index
    %88 = vector.load %arg6[%c96_44, %c0_45] : memref<120x32xf32, #tpu.memory_space<vmem>>, vector<8x32xf32>
    %c104_46 = arith.constant 104 : index
    %c0_47 = arith.constant 0 : index
    %89 = vector.load %arg6[%c104_46, %c0_47] : memref<120x32xf32, #tpu.memory_space<vmem>>, vector<8x32xf32>
    %cst_48 = arith.constant dense<0.000000e+00> : vector<8x160xf32>
    %90 = tpu.matmul %86, %1, %cst_48 {dimension_numbers = #tpu.dot_dimension_numbers<[1], [0], [0], [1], [0, 0, 1, 1], [], []>} : vector<8x32xf32>, vector<32x160xf32>, vector<8x160xf32> -> vector<8x160xf32>
    %cst_49 = arith.constant dense<0.000000e+00> : vector<8x160xf32>
    %91 = tpu.matmul %87, %2, %cst_49 {dimension_numbers = #tpu.dot_dimension_numbers<[1], [0], [0], [1], [0, 0, 1, 1], [], []>} : vector<8x32xf32>, vector<32x160xf32>, vector<8x160xf32> -> vector<8x160xf32>
    %92 = arith.addf %90, %91 : vector<8x160xf32>
    %93 = vector.broadcast %5 : vector<1x160xf32> to vector<8x160xf32>
    %94 = arith.addf %92, %93 : vector<8x160xf32>
    %95 = vector.extract_strided_slice %94 {offsets = [0, 0], sizes = [8, 128], strides = [1, 1]} : vector<8x160xf32> to vector<8x128xf32>
    %96 = arith.negf %95 : vector<8x128xf32>
    %97 = math.exp %96 : vector<8x128xf32>
    %cst_50 = arith.constant 1.000000e+00 : f32
    %98 = vector.broadcast %cst_50 : f32 to vector<8x128xf32>
    %99 = arith.addf %98, %97 : vector<8x128xf32>
    %100 = arith.divf %98, %99 : vector<8x128xf32>
    %101 = vector.extract_strided_slice %100 {offsets = [0, 0], sizes = [8, 32], strides = [1, 1]} : vector<8x128xf32> to vector<8x32xf32>
    %102 = vector.extract_strided_slice %100 {offsets = [0, 32], sizes = [8, 32], strides = [1, 1]} : vector<8x128xf32> to vector<8x32xf32>
    %103 = vector.extract_strided_slice %100 {offsets = [0, 64], sizes = [8, 32], strides = [1, 1]} : vector<8x128xf32> to vector<8x32xf32>
    %104 = vector.extract_strided_slice %100 {offsets = [0, 96], sizes = [8, 32], strides = [1, 1]} : vector<8x128xf32> to vector<8x32xf32>
    %105 = vector.extract_strided_slice %94 {offsets = [0, 128], sizes = [8, 32], strides = [1, 1]} : vector<8x160xf32> to vector<8x32xf32>
    %106 = math.tanh %105 : vector<8x32xf32>
    %107 = arith.mulf %103, %106 : vector<8x32xf32>
    %108 = arith.mulf %101, %88 : vector<8x32xf32>
    %109 = arith.addf %107, %108 : vector<8x32xf32>
    %110 = arith.mulf %102, %89 : vector<8x32xf32>
    %111 = arith.addf %109, %110 : vector<8x32xf32>
    %112 = math.tanh %111 : vector<8x32xf32>
    %113 = arith.mulf %104, %112 : vector<8x32xf32>
    %c112 = arith.constant 112 : index
    %c0_51 = arith.constant 0 : index
    %114 = vector.load %arg5[%c112, %c0_51] : memref<120x32xf32, #tpu.memory_space<vmem>>, vector<8x32xf32>
    tpu.vector_store %arg5[%c112, %c0_51], %113 {strides = array<i32>} : memref<120x32xf32, #tpu.memory_space<vmem>>, vector<8x32xf32>,
    %c112_52 = arith.constant 112 : index
    %c0_53 = arith.constant 0 : index
    %115 = vector.load %arg6[%c112_52, %c0_53] : memref<120x32xf32, #tpu.memory_space<vmem>>, vector<8x32xf32>
    tpu.vector_store %arg6[%c112_52, %c0_53], %111 {strides = array<i32>} : memref<120x32xf32, #tpu.memory_space<vmem>>, vector<8x32xf32>,
    %c0_54 = arith.constant 0 : index
    %c0_55 = arith.constant 0 : index
    %116 = vector.load %arg5[%c0_54, %c0_55] : memref<120x32xf32, #tpu.memory_space<vmem>>, vector<120x32xf32>
    %cst_56 = arith.constant dense<0.000000e+00> : vector<120x128xf32>
    %117 = tpu.matmul %116, %3, %cst_56 {dimension_numbers = #tpu.dot_dimension_numbers<[1], [0], [0], [1], [0, 0, 1, 1], [], []>} : vector<120x32xf32>, vector<32x128xf32>, vector<120x128xf32> -> vector<120x128xf32>
    %118 = vector.broadcast %6 : vector<1x128xf32> to vector<120x128xf32>
    %119 = arith.addf %117, %118 : vector<120x128xf32>
    %c0_57 = arith.constant 0 : index
    %c0_58 = arith.constant 0 : index
    %120 = vector.load %arg4[%c0_57, %c0_58] : memref<120x128xf32, #tpu.memory_space<vmem>>, vector<120x128xf32>
    tpu.vector_store %arg4[%c0_57, %c0_58], %119 {strides = array<i32>} : memref<120x128xf32, #tpu.memory_space<vmem>>, vector<120x128xf32>,
    return
  }
  func.func @transform_0(%arg0: i32) -> (i32, i32) {
    %c0_i32 = arith.constant 0 : i32
    %c0_i32_0 = arith.constant 0 : i32
    return %arg0, %c0_i32 : i32, i32
  }
  func.func @transform_1(%arg0: i32) -> (i32, i32) {
    %c0_i32 = arith.constant 0 : i32
    %c0_i32_0 = arith.constant 0 : i32
    %c0_i32_1 = arith.constant 0 : i32
    return %c0_i32, %c0_i32_0 : i32, i32
  }
  func.func @transform_2(%arg0: i32) -> (i32, i32) {
    %c0_i32 = arith.constant 0 : i32
    %c0_i32_0 = arith.constant 0 : i32
    %c0_i32_1 = arith.constant 0 : i32
    return %c0_i32, %c0_i32_0 : i32, i32
  }
  func.func @transform_3(%arg0: i32) -> (i32, i32) {
    %c0_i32 = arith.constant 0 : i32
    %c0_i32_0 = arith.constant 0 : i32
    return %arg0, %c0_i32 : i32, i32
  }
}

</mosaic_0001>

<bundles_post_ra>
// kernel: mul.5
= control target key start
LH: loop header
LB: loop body
LE: loop exit
PB: predicated region body
PF: predicated region fallthrough
CT: control target
= control target key end

     0   :  { %s7_s6 = smov 3  ;;  %s21_s9 = smov 3  ;;  %vm4_vm0 = vcmask 64512   ;;  %vm11_vm1 = vcmask 1048512   ;;  %vm18_vm2 = vcmask 982912   ;;  %vm25_vm3 = vcmask 917312   ;;  %s223_s0 = inlined_call_operand.vmem [shape: f32[4,8,8], index: 0, kind: input, shape index: {}]   ;;  %s224_s1 = inlined_call_operand.vmem [shape: f32[256], index: 1, kind: output, shape index: {}]  }
   0x1   :  { %v117_v0 = vld [vmem:[%s223_s0 + $0xf] ss:$16 sm:%s7_s6]   ;;  %s147_s10 = smov 120   ;;  %v119_v1 = vld [vmem:[%s223_s0 + $0xd] ss:$16 sm:%s21_s9]   ;;  %s148_s13 = smov 104  }
   0x2   :  { %9 = vrot.lane.b32.xlu0 %v117_v0, %s147_s10  ;;  %23 = vrot.lane.b32.xlu1 %v119_v1, %s148_s13  ;;  %s14_s14 = smov 3  ;;  %s28_s15 = smov 3  ;;  %vm32_vm4 = vcmask 851712   ;;  %vm39_vm5 = vcmask 786112   ;;  %vm46_vm6 = vcmask 720512   ;;  %vm53_vm7 = vcmask 654912  }
   0x3   :  { %v118_v2 = vld [vmem:[%s223_s0 + $0xe] ss:$16 sm:%s14_s14]   ;;  %v120_v3 = vld [vmem:[%s223_s0 + $0xc] ss:$16 sm:%s28_s15]   ;;  %s35_s20 = smov 3  ;;  %s149_s23 = smov 112  }
   0x4   :  { %v121_v4 = vld [vmem:[%s223_s0 + $0xb] ss:$16 sm:%s35_s20]   ;;  %s150_s24 = smov 88   ;;  %s151_s25 = smov 96   ;;  %vm60_vm8 = vcmask 589312   ;;  %vm67_vm9 = vcmask 523712  }
   0x5   :  { %37 = vrot.lane.b32.xlu2 %v121_v4, %s150_s24  ;;  %s49_s26 = smov 3  ;;  %s42_s27 = smov 3  ;;  %vm74_vm10 = vcmask 458112   ;;  %vm81_vm11 = vcmask 392512   ;;  %vm88_vm12 = vcmask 326912   ;;  %vm95_vm13 = vcmask 261312  }
   0x6   :  { %s56_s28 = smov 3  ;;  %v123_v5 = vld [vmem:[%s223_s0 + $0x9] ss:$16 sm:%s49_s26]   ;;  %v122_v6 = vld [vmem:[%s223_s0 + $0xa] ss:$16 sm:%s42_s27]   ;;  %s152_s6 = smov 72  }
   0x7   :  { %v124_v7 = vld [vmem:[%s223_s0 + $0x8] ss:$16 sm:%s56_s28]   ;;  %s153_s7 = smov 80   ;;  %s154_s8 = smov 64   ;;  %vm102_vm14 = vcmask 195712   ;;  %vm109_vm15 = vcmask 130112  }
   0x8   :  { %s70_s9 = smov 3  ;;  %s63_s10 = smov 3 }
   0x9   :  { %s77_s11 = smov 3  ;;  %v126_v8 = vld [vmem:[%s223_s0 + $0x6] ss:$16 sm:%s70_s9]   ;;  %v125_v9 = vld [vmem:[%s223_s0 + $0x7] ss:$16 sm:%s63_s10]   ;;  %s155_s18 = smov 48  }
   0xa   :  { %16 = vrot.lane.b32.xlu0 %v118_v2, %s149_s23  ;;  %30 = vrot.lane.b32.xlu1 %v120_v3, %s151_s25  ;;  %v127_v10 = vld [vmem:[%s223_s0 + $0x5] ss:$16 sm:%s77_s11]   ;;  %s156_s19 = smov 56   ;;  %s157_s20 = smov 40  }
   0xb   :  { %s91_s21 = smov 3  ;;  %s84_s22 = smov 3 }
   0xc   :  { %s98_s23 = smov 3  ;;  %v129_v11 = vld [vmem:[%s223_s0 + $0x3] ss:$16 sm:%s91_s21]   ;;  %v128_v12 = vld [vmem:[%s223_s0 + $0x4] ss:$16 sm:%s84_s22]   ;;  %s158_s30 = smov 24  }
   0xd   :  { %44 = vrot.lane.b32.xlu2 %v122_v6, %s153_s7  ;;  %v130_v13 = vld [vmem:[%s223_s0 + $0x2] ss:$16 sm:%s98_s23]   ;;  %s159_s2 = smov 32   ;;  %s160_s3 = smov 16  }
   0xe   :  { %s105_s4 = smov 3  ;;  %s161_s7 = smov 8  }
   0xf   :  { %v131_v14 = vld [vmem:[%s223_s0 + $0x1] ss:$16 sm:%s105_s4]  }
  0x12   :  { %51 = vrot.lane.b32.xlu0 %v123_v5, %s152_s6  ;;  %58 = vrot.lane.b32.xlu1 %v124_v7, %s154_s8  ;;  %s2_s8 = smov 3 }
  0x13   :  { %v3_v15 = vld [vmem:[%s223_s0] ss:$16 sm:%s2_s8]  }
  0x14   :  { %5 = vst.msk [vmem:[#allocation0] sm:$0x3] %vm4_vm0, %v3_v15  }
  0x15   :  { %65 = vrot.lane.b32.xlu2 %v125_v9, %s156_s19 }
  0x1a   :  { %72 = vrot.lane.b32.xlu0 %v126_v8, %s155_s18  ;;  %79 = vrot.lane.b32.xlu1 %v127_v10, %s157_s20 }
  0x1d   :  { %86 = vrot.lane.b32.xlu2 %v128_v12, %s159_s2 }
  0x22   :  { %93 = vrot.lane.b32.xlu0 %v129_v11, %s158_s30  ;;  %100 = vrot.lane.b32.xlu1 %v130_v13, %s160_s3 }
  0x25   :  { %107 = vrot.lane.b32.xlu2 %v131_v14, %s161_s7 }
  0x5f   :  { %v38_v16 = vpop.permute.xlu2 %37  }
  0x67   :  { %v45_v17 = vpop.permute.xlu2 %44  }
  0x6f   :  { %v66_v19 = vpop.permute.xlu2 %65  }
  0x74   :  { %v10_v18 = vpop.permute.xlu0 %9   ;;  %v24_v20 = vpop.permute.xlu1 %23  }
  0x75   :  { %12 = vst.msk [vmem:[#allocation0] sm:$0x3] %vm11_vm1, %v10_v18  }
  0x77   :  { %v87_v22 = vpop.permute.xlu2 %86  }
  0x7c   :  { %v17_v21 = vpop.permute.xlu0 %16   ;;  %v31_v23 = vpop.permute.xlu1 %30  }
  0x7d   :  { %19 = vst.msk [vmem:[#allocation0] sm:$0x3] %vm18_vm2, %v17_v21  }
  0x7e   :  { %26 = vst.msk [vmem:[#allocation0] sm:$0x3] %vm25_vm3, %v24_v20  }
  0x7f   :  { %33 = vst.msk [vmem:[#allocation0] sm:$0x3] %vm32_vm4, %v31_v23   ;;  %v108_v25 = vpop.permute.xlu2 %107  }
  0x80   :  { %40 = vst.msk [vmem:[#allocation0] sm:$0x3] %vm39_vm5, %v38_v16  }
  0x81   :  { %47 = vst.msk [vmem:[#allocation0] sm:$0x3] %vm46_vm6, %v45_v17  }
  0x84   :  { %v52_v24 = vpop.permute.xlu0 %51   ;;  %v59_v26 = vpop.permute.xlu1 %58  }
  0x85   :  { %54 = vst.msk [vmem:[#allocation0] sm:$0x3] %vm53_vm7, %v52_v24  }
  0x86   :  { %61 = vst.msk [vmem:[#allocation0] sm:$0x3] %vm60_vm8, %v59_v26  }
  0x87   :  { %68 = vst.msk [vmem:[#allocation0] sm:$0x3] %vm67_vm9, %v66_v19  }
  0x8c   :  { %v73_v27 = vpop.permute.xlu0 %72   ;;  %v80_v28 = vpop.permute.xlu1 %79  }
  0x8d   :  { %75 = vst.msk [vmem:[#allocation0] sm:$0x3] %vm74_vm10, %v73_v27  }
  0x8e   :  { %82 = vst.msk [vmem:[#allocation0] sm:$0x3] %vm81_vm11, %v80_v28  }
  0x8f   :  { %89 = vst.msk [vmem:[#allocation0] sm:$0x3] %vm88_vm12, %v87_v22  }
  0x94   :  { %v94_v29 = vpop.permute.xlu0 %93   ;;  %v101_v30 = vpop.permute.xlu1 %100  }
  0x95   :  { %96 = vst.msk [vmem:[#allocation0] sm:$0x3] %vm95_vm13, %v94_v29  }
  0x96   :  { %103 = vst.msk [vmem:[#allocation0] sm:$0x3] %vm102_vm14, %v101_v30  }
  0x97   :  { %110 = vst.msk [vmem:[#allocation0] sm:$0x3] %vm109_vm15, %v108_v25  }
  0x9e   :  { %v113_v31 = vld [vmem:[#allocation0] sm:$0x3] }
  0x9f   :  { %116 = vst [vmem:[%s224_s1] sm:$0x3] %v113_v31 }

// kernel: tree_lstm_forward.1
= control target key start
LH: loop header
LB: loop body
LE: loop exit
PB: predicated region body
PF: predicated region fallthrough
CT: control target
= control target key end

     0   :  { %s1768_s12 = smov 0   ;;  %s2351_s0 = inlined_call_operand.vmem [shape: f32[256,128], index: 0, kind: input, shape index: {}]   ;;  %s2352_s1 = inlined_call_operand.vmem [shape: f32[224,160], index: 1, kind: input, shape index: {}]   ;;  %s2353_s2 = inlined_call_operand.vmem [shape: f32[3,160], index: 2, kind: input, shape index: {}]   ;;  %s2354_s3 = inlined_call_operand.vmem [shape: f32[480,128], index: 3, kind: output, shape index: {}]  }
   0x1 LB: > { %s1531_s13 = sadd.s32 4294967295, %s1743_s12   ;;  %p1535_p0 = scmp.ge.s32.totalorder %s1743_s12, 1  ;;  %s1743_s12 = sphi %s1768_s12, %s13_s12  }
   0x2   : > { %p138_p1 = scmp.lt.s32.totalorder %s1743_s12, 5 }
   0x4   : > { %p139_p2 = pnand %p1535_p0, %p138_p1 }
   0x5   : > { %s1536_s30 = sshll.u32 (!%p139_p2), %s1531_s13, 3  ;;  %s1745_s28 = smov (!%p139_p2), 64  }
   0x6   : > { %142 = sbr.rel (%p139_p2) target bundleno = 2373 (0x945), region = 32  ;;  %p163_p3 = scmp.lt.s32.totalorder (!%p139_p2), %s1536_s30, 31 }
   0x7   : > { %s1746_s29 = smov (!%p139_p2), 32   ;;  %s168_s25 = smul.u32 (!%p139_p2), 15, %s1531_s13 }
   0x9   : > { %p169_p4 = scmp.lt.s32.totalorder (!%p139_p2), %s168_s25, 59 }
   0xb   : > { %v189_v0 = vld [vmem:[%s2352_s1 + $0xf0] sm:$0xff]  ;;  %v188_v1 = vld [vmem:[%s2352_s1 + $0xe0] sm:$0xff]  ;;  %s2358_s30 = smov (!%p163_p3, %s1536_s30), 31  ;;  %vm544_vm4 = vcmask 261120   ;;  %s2360_s25 = smov (!%p169_p4, %s168_s25), 59 }
   0xc   : > { %223 = vmatpush.msra.mxu0 %v189_v0  ;;  %v187_v2 = vld [vmem:[%s2352_s1 + $0xd0] sm:$0xff]  ;;  %v186_v3 = vld [vmem:[%s2352_s1 + $0xc0] sm:$0xff]  ;;  %s1537_s16 = sshll.u32 %s2358_s30, 3  ;;  %s1747_s30 = smov 96  }
   0xd   : > { %v185_v4 = vld [vmem:[%s2352_s1 + $0xb0] sm:$0xff]  ;;  %v184_v5 = vld [vmem:[%s2352_s1 + $0xa0] sm:$0xff]  ;;  %s166_s23 = scalar_lea.vmem %s2351_s0, %s1537_s16  ;;  %s1538_s26 = sshll.u32 %s2360_s25, 3 }
   0xe   : > { %224 = vmatpush.msra.mxu0 %v188_v1  ;;  %v183_v6 = vld [vmem:[%s2352_s1 + $0x90] sm:$0xff]  ;;  %v182_v7 = vld [vmem:[%s2352_s1 + $0x80] sm:$0xff]  ;;  %v215_v17 = vld [vmem:[%s166_s23 + $0x8] sm:$0xff]  ;;  %s2306_s6 = scalar_lea.vmem %s2354_s3, %s1538_s26 }
   0xf   : > { %v181_v8 = vld [vmem:[%s2352_s1 + $0x70] sm:$0xff]  ;;  %v180_v9 = vld [vmem:[%s2352_s1 + $0x60] sm:$0xff]  ;;  %v217_v19 = vld [vmem:[%s166_s23 + $0x18] sm:$0xff] }
  0x10   : > { %225 = vmatpush.msra.mxu0 %v187_v2  ;;  %v179_v10 = vld [vmem:[%s2352_s1 + $0x50] sm:$0xff]  ;;  %v178_v11 = vld [vmem:[%s2352_s1 + $0x40] sm:$0xff]  ;;  %v219_v21 = vld [vmem:[%s166_s23 + $0x28] sm:$0xff] }
  0x11   : > { %v177_v12 = vld [vmem:[%s2352_s1 + $0x30] sm:$0xff]  ;;  %v176_v13 = vld [vmem:[%s2352_s1 + $0x20] sm:$0xff]  ;;  %v221_v23 = vld [vmem:[%s166_s23 + $0x38] sm:$0xff] }
  0x12   : > { %226 = vmatpush.msra.mxu0 %v186_v3  ;;  %v175_v14 = vld [vmem:[%s2352_s1 + $0x10] sm:$0xff]  ;;  %v174_v15 = vld [vmem:[%s2352_s1] sm:$0xff] }
  0x13   : > { %v214_v16 = vld [vmem:[%s166_s23] sm:$0xff]  ;;  %v216_v18 = vld [vmem:[%s166_s23 + $0x10] sm:$0xff] }
  0x14   : > { %227 = vmatpush.msra.mxu0 %v185_v4  ;;  %v218_v20 = vld [vmem:[%s166_s23 + $0x20] sm:$0xff]  ;;  %v220_v22 = vld [vmem:[%s166_s23 + $0x30] sm:$0xff] }
  0x15   : > { %v1615_v24 = vld [vmem:[%s2353_s2] ss:$0 sm:$0xff] }
  0x16   : > { %228 = vmatpush.msra.mxu0 %v184_v5 }
  0x18   : > { %229 = vmatpush.msra.mxu0 %v183_v6 }
  0x1a   : > { %230 = vmatpush.msra.mxu0 %v182_v7 }
  0x1c   : > { %231 = vmatpush.msra.mxu0 %v181_v8 }
  0x1e   : > { %232 = vmatpush.msra.mxu0 %v180_v9 }
  0x20   : > { %233 = vmatpush.msra.mxu0 %v179_v10 }
  0x22   : > { %234 = vmatpush.msra.mxu0 %v178_v11 }
  0x24   : > { %235 = vmatpush.msra.mxu0 %v177_v12 }
  0x26   : > { %236 = vmatpush.msra.mxu0 %v176_v13 }
  0x28   : > { %237 = vmatpush.msra.mxu0 %v175_v14 }
  0x2a   : > { %238 = vmatpush.msra.mxu0 %v174_v15 }
  0x2b   : > { %239 = vmatmul.f32.vlgmr.msra.gmra.mxu0 %v214_v16 }
  0x33   : > { %242 = vmatmul.f32.gmra.mxu0 %v215_v17 }
  0x3b   : > { %245 = vmatmul.f32.gmra.mxu0 %v216_v18 }
  0x43   : > { %248 = vmatmul.f32.gmra.mxu0 %v217_v19 }
  0x4b   : > { %251 = vmatmul.f32.gmra.mxu0 %v218_v20 }
  0x53   : > { %254 = vmatmul.f32.gmra.mxu0 %v219_v21 }
  0x5b   : > { %257 = vmatmul.f32.gmra.mxu0 %v220_v22 }
  0x63   : > { %260 = vmatmul.f32.gmra.mxu0 %v221_v23 }
  0xa8   : > { %v240_v25 = vpop.f32.mrf.mxu0 }
  0xa9   : > { %v241_v26 = vadd.f32 %v1615_v24, %v240_v25 }
  0xab   : > { %1617 = vtanh.f32 %v241_v26  ;;  %v1540_v44 = vmul.f32 -1.442695, %v241_v26 }
  0xb0   : > { %v243_v27 = vpop.f32.mrf.mxu0 }
  0xb1   : > { %v1618_v28 = vpop.eup %1617  ;;  %v244_v29 = vadd.f32 %v1615_v24, %v243_v27 }
  0xb2   : > { %432 = vrot.lane.b32.xlu2 %v1618_v28, %s1745_s28 }
  0xb3   : > { %1619 = vtanh.f32 %v244_v29  ;;  %v1541_v49 = vmul.f32 -1.442695, %v244_v29 }
  0xb8   : > { %v246_v30 = vpop.f32.mrf.mxu0 }
  0xb9   : > { %v1620_v31 = vpop.eup %1619  ;;  %v1842_v40 = vadd.f32 %v1615_v24, %v246_v30 }
  0xba   : > { %434 = vrot.lane.b32.xlu2 %v1620_v31, %s1745_s28 }
  0xc0   : > { %v249_v32 = vpop.f32.mrf.mxu0 }
  0xc1   : > { %v250_v33 = vadd.f32 %v1615_v24, %v249_v32 }
  0xc3   : > { %1621 = vtanh.f32 %v250_v33  ;;  %v1543_v56 = vmul.f32 -1.442695, %v250_v33 }
  0xc8   : > { %v252_v34 = vpop.f32.mrf.mxu0 }
  0xc9   : > { %v1622_v35 = vpop.eup %1621  ;;  %v1834_v36 = vadd.f32 %v1615_v24, %v252_v34  ;;  %v1542_v34 = vmul.f32 -1.442695, %v1842_v40 }
  0xca   : > { %438 = vrot.lane.b32.xlu2 %v1622_v35, %s1745_s28 }
  0xcb   : > { %1623 = vtanh.f32 %v1834_v36  ;;  %v1544_v21 = vmul.f32 -1.442695, %v1834_v36 }
  0xd0   : > { %v255_v37 = vpop.f32.mrf.mxu0 }
  0xd1   : > { %v1624_v38 = vpop.eup %1623  ;;  %v1838_v39 = vadd.f32 %v1615_v24, %v255_v37 }
  0xd2   : > { %440 = vrot.lane.b32.xlu0 %v1624_v38, %s1745_s28 }
  0xd3   : > { %1625 = vtanh.f32 %v1838_v39  ;;  %v1545_v25 = vmul.f32 -1.442695, %v1838_v39 }
  0xd4   : > { %1627 = vtanh.f32 %v1842_v40 }
  0xd8   : > { %v258_v41 = vpop.f32.mrf.mxu0 }
  0xd9   : > { %v1626_v42 = vpop.eup %1625  ;;  %v1844_v43 = vadd.f32 %v1615_v24, %v258_v41 }
  0xda   : > { %442 = vrot.lane.b32.xlu0 %v1626_v42, %s1745_s28  ;;  %v1628_v45 = vpop.eup %1627 }
  0xdb   : > { %1629 = vtanh.f32 %v1844_v43  ;;  %v1546_v35 = vmul.f32 -1.442695, %v1844_v43 }
  0xdc   : > { %1631 = vpow2.f32 %v1540_v44 }
  0xe0   : > { %v261_v46 = vpop.f32.mrf.mxu0 }
  0xe1   : > { %v1630_v47 = vpop.eup %1629  ;;  %v1849_v48 = vadd.f32 %v1615_v24, %v261_v46 }
  0xe2   : > { %444 = vrot.lane.b32.xlu1 %v1630_v47, %s1745_s28  ;;  %436 = vrot.lane.b32.xlu0 %v1628_v45, %s1745_s28  ;;  %v1632_v50 = vpop.eup %1631 }
  0xe3   : > { %1633 = vtanh.f32 %v1849_v48  ;;  %v288_v52 = vadd.f32 1.0, %v1632_v50  ;;  %v1547_v39 = vmul.f32 -1.442695, %v1849_v48 }
  0xe4   : > { %1635 = vpow2.f32 %v1541_v49 }
  0xe5   : > { %1637 = vrcp.f32 %v288_v52  ;;  %v307_v2 = vand.u32 2147483648, %v288_v52  ;;  %vm301_vm1 = vweird.f32 %v288_v52  ;;  %v305_v3 = vand.u32 2147483647, %v288_v52 }
  0xe7   : > { %v308_v6 = vor.u32 1.1754944e-38, %v307_v2  ;;  %vm306_vm3 = vcmp.eq.f32.partialorder %v305_v3, 8.507059e+37 }
  0xe9   : > { %v1634_v51 = vpop.eup %1633 }
  0xea   : > { %446 = vrot.lane.b32.xlu1 %v1634_v51, %s1745_s28  ;;  %v1636_v53 = vpop.eup %1635 }
  0xeb   : > { %v289_v54 = vadd.f32 1.0, %v1636_v53  ;;  %v1638_v55 = vpop.eup %1637 }
  0xec   : > { %v297_v57 = vmul.f32 %v1638_v55, %v288_v52  ;;  %vm302_vm0 = vweird.f32 %v1638_v55 }
  0xed   : > { %1639 = vrcp.f32 %v289_v54  ;;  %vm303_vm2 = vmor %vm301_vm1, %vm302_vm0  ;;  %v322_v12 = vand.u32 2147483648, %v289_v54  ;;  %vm316_vm6 = vweird.f32 %v289_v54  ;;  %v320_v13 = vand.u32 2147483647, %v289_v54 }
  0xee   : > { %1641 = vpow2.f32 %v1543_v56  ;;  %v298_v58 = vsub.f32 1.0, %v297_v57 }
  0xef   : > { %v323_v16 = vor.u32 1.1754944e-38, %v322_v12  ;;  %vm321_vm8 = vcmp.eq.f32.partialorder %v320_v13, 8.507059e+37 }
  0xf0   : > { %v299_v61 = vmul.f32 %v1638_v55, %v298_v58 }
  0xf2   : > { %v300_v0 = vadd.f32 %v1638_v55, %v299_v61 }
  0xf3   : > { %v1640_v59 = vpop.eup %1639 }
  0xf4   : > { %v1642_v60 = vpop.eup %1641  ;;  %v312_v62 = vmul.f32 %v1640_v59, %v289_v54  ;;  %v304_v4 = vsel %vm303_vm2, %v1638_v55, %v300_v0  ;;  %vm317_vm5 = vweird.f32 %v1640_v59 }
  0xf5   : > { %v291_v63 = vadd.f32 1.0, %v1642_v60  ;;  %v1855_v8 = vsel %vm306_vm3, %v308_v6, %v304_v4  ;;  %vm318_vm7 = vmor %vm316_vm6, %vm317_vm5 }
  0xf6   : > { %v313_v1 = vsub.f32 1.0, %v312_v62 }
  0xf7   : > { %1643 = vrcp.f32 %v291_v63  ;;  %v352_v24 = vand.u32 2147483648, %v291_v63  ;;  %vm346_vm10 = vweird.f32 %v291_v63  ;;  %v350_v26 = vand.u32 2147483647, %v291_v63 }
  0xf8   : > { %v314_v5 = vmul.f32 %v1640_v59, %v313_v1  ;;  %1645 = vpow2.f32 %v1544_v21 }
  0xf9   : > { %v353_v29 = vor.u32 1.1754944e-38, %v352_v24  ;;  %1647 = vpow2.f32 %v1545_v25  ;;  %vm351_vm12 = vcmp.eq.f32.partialorder %v350_v26, 8.507059e+37 }
  0xfa   : > { %v315_v10 = vadd.f32 %v1640_v59, %v314_v5 }
  0xfc   : > { %v319_v14 = vsel %vm318_vm7, %v1640_v59, %v315_v10 }
  0xfd   : > { %v1644_v11 = vpop.eup %1643  ;;  %v1862_v17 = vsel %vm321_vm8, %v323_v16, %v319_v14 }
  0xfe   : > { %v342_v15 = vmul.f32 %v1644_v11, %v291_v63  ;;  %vm347_vm9 = vweird.f32 %v1644_v11  ;;  %v1646_v27 = vpop.eup %1645 }
  0xff   : > { %vm348_vm11 = vmor %vm346_vm10, %vm347_vm9  ;;  %v292_v30 = vadd.f32 1.0, %v1646_v27  ;;  %v1648_v36 = vpop.eup %1647 }
 0x100   : > { %v343_v20 = vsub.f32 1.0, %v342_v15  ;;  %v293_v37 = vadd.f32 1.0, %v1648_v36 }
 0x101   : > { %1649 = vrcp.f32 %v292_v30  ;;  %v367_v55 = vand.u32 2147483648, %v292_v30  ;;  %vm361_vm14 = vweird.f32 %v292_v30  ;;  %v365_v56 = vand.u32 2147483647, %v292_v30 }
 0x102   : > { %v344_v22 = vmul.f32 %v1644_v11, %v343_v20  ;;  %1651 = vpow2.f32 %v1542_v34  ;;  %vm376_vm1 = vweird.f32 %v293_v37  ;;  %v382_v0 = vand.u32 2147483648, %v293_v37 }
 0x103   : > { %1653 = vpow2.f32 %v1546_v35  ;;  %v368_v61 = vor.u32 1.1754944e-38, %v367_v55  ;;  %vm366_vm0 = vcmp.eq.f32.partialorder %v365_v56, 8.507059e+37  ;;  %v380_v4 = vand.u32 2147483647, %v293_v37 }
 0x104   : > { %v345_v23 = vadd.f32 %v1644_v11, %v344_v22  ;;  %1655 = vrcp.f32 %v293_v37 }
 0x105   : > { %1657 = vpow2.f32 %v1547_v39  ;;  %vm381_vm5 = vcmp.eq.f32.partialorder %v380_v4, 8.507059e+37 }
 0x106   : > { %v349_v28 = vsel %vm348_vm11, %v1644_v11, %v345_v23 }
 0x107   : > { %v1871_v31 = vsel %vm351_vm12, %v353_v29, %v349_v28  ;;  %v1650_v38 = vpop.eup %1649 }
 0x108   : > { %v1652_v41 = vpop.eup %1651  ;;  %v357_v44 = vmul.f32 %v1650_v38, %v292_v30  ;;  %vm362_vm13 = vweird.f32 %v1650_v38 }
 0x109   : > { %v1654_v42 = vpop.eup %1653  ;;  %v1881_v45 = vadd.f32 1.0, %v1652_v41  ;;  %vm363_vm15 = vmor %vm361_vm14, %vm362_vm13 }
 0x10a   : > { %v1883_v40 = vadd.f32 1.0, %v1654_v42  ;;  %v358_v43 = vsub.f32 1.0, %v357_v44  ;;  %v1656_v46 = vpop.eup %1655 }
 0x10b   : > { %1659 = vrcp.f32 %v1881_v45  ;;  %v1658_v47 = vpop.eup %1657  ;;  %v372_v50 = vmul.f32 %v1656_v46, %v293_v37  ;;  %vm377_vm2 = vweird.f32 %v1656_v46  ;;  %v337_v26 = vand.u32 2147483648, %v1881_v45 }
 0x10c   : > { %v433_v7 = vpop.permute.xlu2 %432  ;;  %1661 = vrcp.f32 %v1883_v40  ;;  %v359_v49 = vmul.f32 %v1650_v38, %v358_v43  ;;  %v1887_v51 = vadd.f32 1.0, %v1658_v47  ;;  %vm378_vm3 = vmor %vm376_vm1, %vm377_vm2  ;;  %vm391_vm6 = vweird.f32 %v1883_v40 }
 0x10d   : > { %v1858_v9 = vmul.f32 %v433_v7, %v1855_v8  ;;  %v373_v53 = vsub.f32 1.0, %v372_v50  ;;  %v383_v7 = vor.u32 1.1754944e-38, %v382_v0  ;;  %v397_v16 = vand.u32 2147483648, %v1883_v40 }
 0x10e   : > { %v360_v52 = vadd.f32 %v1650_v38, %v359_v49  ;;  %1663 = vrcp.f32 %v1887_v51  ;;  %v395_v23 = vand.u32 2147483647, %v1883_v40  ;;  %vm331_vm10 = vweird.f32 %v1881_v45 }
 0x10f   : > { %553 = vst.msk [vmem:[#allocation3] sm:$0xff] %vm544_vm4, %v1858_v9  ;;  %v374_v59 = vmul.f32 %v1656_v46, %v373_v53  ;;  %v335_v27 = vand.u32 2147483647, %v1881_v45  ;;  %v398_v28 = vor.u32 1.1754944e-38, %v397_v16  ;;  %v338_v34 = vor.u32 1.1754944e-38, %v337_v26 }
 0x110   : > { %v364_v58 = vsel %vm363_vm15, %v1650_v38, %v360_v52  ;;  %vm396_vm12 = vcmp.eq.f32.partialorder %v395_v23, 8.507059e+37  ;;  %vm406_vm14 = vweird.f32 %v1887_v51  ;;  %v412_v39 = vand.u32 2147483648, %v1887_v51  ;;  %v192_v23 = vld [vmem:[%s2352_s1 + $0x110] sm:$0xff] }
 0x111   : > { %v1889_v48 = vpop.eup %1659  ;;  %v1898_v63 = vsel %vm366_vm0, %v368_v61, %v364_v58  ;;  %v375_v3 = vadd.f32 %v1656_v46, %v374_v59  ;;  %vm336_vm13 = vcmp.eq.f32.partialorder %v335_v27, 8.507059e+37 }
 0x112   : > { %v1891_v54 = vpop.eup %1661  ;;  %v327_v57 = vmul.f32 %v1889_v48, %v1881_v45  ;;  %vm332_vm8 = vweird.f32 %v1889_v48  ;;  %v413_v43 = vor.u32 1.1754944e-38, %v412_v39 }
 0x113   : > { %v387_v60 = vmul.f32 %v1891_v54, %v1883_v40  ;;  %v379_v11 = vsel %vm378_vm3, %v1656_v46, %v375_v3  ;;  %vm392_vm7 = vweird.f32 %v1891_v54  ;;  %vm333_vm11 = vmor %vm331_vm10, %vm332_vm8  ;;  %v410_v40 = vand.u32 2147483647, %v1887_v51 }
 0x114   : > { %v435_v18 = vpop.permute.xlu2 %434  ;;  %v328_v1 = vsub.f32 1.0, %v327_v57  ;;  %v1664_v6 = vpop.eup %1663  ;;  %v1907_v14 = vsel %vm381_vm5, %v383_v7, %v379_v11  ;;  %vm1916_vm9 = vmor %vm391_vm6, %vm392_vm7  ;;  %v1980_v7 = vld [vmem:[%s2352_s1 + $0x168] sm:$0xff]  ;;  %v1990_v11 = vld [vmem:[%s2352_s1 + $0x158] sm:$0xff] }
 0x115   : > { %v1865_v19 = vmul.f32 %v435_v18, %v1862_v17  ;;  %v388_v5 = vsub.f32 1.0, %v387_v60  ;;  %v402_v13 = vmul.f32 %v1664_v6, %v1887_v51  ;;  %vm407_vm15 = vweird.f32 %v1664_v6 }
 0x116   : > { %v329_v10 = vmul.f32 %v1889_v48, %v328_v1  ;;  %vm408_vm0 = vmor %vm406_vm14, %vm407_vm15  ;;  %vm411_vm1 = vcmp.eq.f32.partialorder %v410_v40, 8.507059e+37 }
 0x117   : > { %554 = vst.msk [vmem:[#allocation3 + $0x8] sm:$0xff] %vm544_vm4, %v1865_v19  ;;  %v389_v12 = vmul.f32 %v1891_v54, %v388_v5  ;;  %v403_v24 = vsub.f32 1.0, %v402_v13  ;;  %v1963_v5 = vld [vmem:[%s2352_s1 + $0x170] sm:$0xff]  ;;  %v2003_v13 = vld [vmem:[%s2352_s1 + $0x148] sm:$0xff] }
 0x118   : > { %v330_v18 = vadd.f32 %v1889_v48, %v329_v10  ;;  %601 = vmatpush.msra.mxu1 %v1963_v5  ;;  %v1985_v10 = vld [vmem:[%s2352_s1 + $0x150] sm:$0xff] }
 0x119   : > { %v390_v22 = vadd.f32 %v1891_v54, %v389_v12  ;;  %v1998_v12 = vld [vmem:[%s2352_s1 + $0x140] sm:$0xff] }
 0x11a   : > { %v334_v30 = vsel %vm333_vm11, %v1889_v48, %v330_v18 }
 0x11b   : > { %v394_v29 = vsel %vm1916_vm9, %v1891_v54, %v390_v22  ;;  %v339_v38 = vsel %vm336_vm13, %v338_v34, %v334_v30  ;;  %v196_v22 = vld [vmem:[%s2352_s1 + $0x130] sm:$0xff]  ;;  %v197_v34 = vld [vmem:[%s2352_s1 + $0x138] sm:$0xff] }
 0x11c   : > { %v399_v36 = vsel %vm396_vm12, %v398_v28, %v394_v29  ;;  %1059 = vmatpush.msra.mxu3 %v197_v34 }
 0x124   : > { %v439_v32 = vpop.permute.xlu2 %438 }
 0x125   : > { %v1874_v33 = vmul.f32 %v439_v32, %v1871_v31  ;;  %v404_v32 = vmul.f32 %v1664_v6, %v403_v24  ;;  %v190_v24 = vld [vmem:[%s2352_s1 + $0x100] sm:$0xff] }
 0x127   : > { %556 = vst.msk [vmem:[#allocation3 + $0x18] sm:$0xff] %vm544_vm4, %v1874_v33  ;;  %v405_v45 = vadd.f32 %v1664_v6, %v404_v32 }
 0x129   : > { %v409_v46 = vsel %vm408_vm0, %v1664_v6, %v405_v45  ;;  %v1973_v6 = vld [vmem:[%s2352_s1 + $0x160] sm:$0xff] }
 0x12a   : > { %v414_v49 = vsel %vm411_vm1, %v413_v43, %v409_v46  ;;  %602 = vmatpush.msra.mxu1 %v1973_v6 }
 0x12c   : > { %603 = vmatpush.msra.mxu1 %v1985_v10 }
 0x12e   : > { %604 = vmatpush.msra.mxu1 %v1998_v12 }
 0x130   : > { %671 = vmatpush.msrb.mxu1 %v196_v22 }
 0x144   : > { %v441_v62 = vpop.permute.xlu0 %440 }
 0x145   : > { %v460_v2 = vmul.f32 %v441_v62, %v1898_v63 }
 0x147   : > { %1665 = vtanh.f32 %v460_v2  ;;  %557 = vst.msk [vmem:[#allocation3 + $0x20] sm:$0xff] %vm544_vm4, %v460_v2 }
 0x14c   : > { %v443_v15 = vpop.permute.xlu0 %442 }
 0x14d   : > { %v1666_v20 = vpop.eup %1665  ;;  %v461_v21 = vmul.f32 %v443_v15, %v1907_v14 }
 0x14e   : > { %488 = vrot.lane.b32.xlu1 %v1666_v20, %s1746_s29 }
 0x14f   : > { %1667 = vtanh.f32 %v461_v21  ;;  %558 = vst.msk [vmem:[#allocation3 + $0x28] sm:$0xff] %vm544_vm4, %v461_v21  ;;  %v573_v21 = vld [vmem:[#allocation3 + $0x20] sm:$0xff] }
 0x150   : > { %1669 = vtanh.f32 %v1858_v9 }
 0x154   : > { %v445_v35 = vpop.permute.xlu1 %444  ;;  %v437_v37 = vpop.permute.xlu0 %436 }
 0x155   : > { %v1668_v41 = vpop.eup %1667  ;;  %v462_v42 = vmul.f32 %v445_v35, %v399_v36  ;;  %v458_v44 = vmul.f32 %v437_v37, %v339_v38  ;;  %v195_v35 = vld [vmem:[%s2352_s1 + $0x128] sm:$0xff] }
 0x156   : > { %490 = vrot.lane.b32.xlu0 %v1668_v41, %s1746_s29  ;;  %v1670_v47 = vpop.eup %1669  ;;  %1060 = vmatpush.msra.mxu3 %v195_v35  ;;  %v191_v41 = vld [vmem:[%s2352_s1 + $0x108] sm:$0xff] }
 0x157   : > { %1671 = vtanh.f32 %v462_v42  ;;  %559 = vst.msk [vmem:[#allocation3 + $0x30] sm:$0xff] %vm544_vm4, %v462_v42 }
 0x158   : > { %555 = vst.msk [vmem:[#allocation3 + $0x10] sm:$0xff] %vm544_vm4, %v458_v44  ;;  %1673 = vtanh.f32 %v1865_v19 }
 0x15c   : > { %v447_v50 = vpop.permute.xlu1 %446 }
 0x15d   : > { %v1672_v48 = vpop.eup %1671  ;;  %v463_v52 = vmul.f32 %v447_v50, %v414_v49 }
 0x15e   : > { %492 = vrot.lane.b32.xlu1 %v1672_v48, %s1746_s29  ;;  %480 = vrot.lane.b32.xlu0 %v1670_v47, %s1746_s29  ;;  %v1674_v9 = vpop.eup %1673  ;;  %v575_v3 = vld [vmem:[#allocation3 + $0x30] sm:$0xff]  ;;  %v2106_v48 = vld [vmem:[%s2353_s2 + $0x1] ss:$4 sm:$0x3] }
 0x15f   : > { %1675 = vtanh.f32 %v463_v52  ;;  %560 = vst.msk [vmem:[#allocation3 + $0x38] sm:$0xff] %vm544_vm4, %v463_v52 }
 0x160   : > { %1677 = vtanh.f32 %v458_v44 }
 0x161   : > { %1679 = vtanh.f32 %v1874_v33 }
 0x165   : > { %v1676_v51 = vpop.eup %1675 }
 0x166   : > { %v1678_v53 = vpop.eup %1677  ;;  %494 = vrot.lane.b32.xlu2 %v1676_v51, %s1746_s29  ;;  %482 = vrot.lane.b32.xlu1 %v1674_v9, %s1746_s29  ;;  %v576_v4 = vld [vmem:[#allocation3 + $0x38] sm:$0xff]  ;;  %v2109_v9 = vperm.slane %v2106_v48, 0 }
 0x167   : > { %484 = vrot.lane.b32.xlu0 %v1678_v53, %s1746_s29  ;;  %v1680_v57 = vpop.eup %1679 }
 0x1c0   : > { %v489_v54 = vpop.permute.xlu1 %488  ;;  %v495_v58 = vpop.permute.xlu2 %494 }
 0x1c1   : > { %v508_v19 = vmul.f32 %v489_v54, %v1898_v63  ;;  %v511_v61 = vmul.f32 %v495_v58, %v414_v49 }
 0x1c3   : > { %528 = vrot.lane.b32.xlu2 %v508_v19, %s1747_s30 }
 0x1c8   : > { %v491_v55 = vpop.permute.xlu0 %490 }
 0x1c9   : > { %v509_v56 = vmul.f32 %v491_v55, %v1907_v14 }
 0x1cb   : > { %530 = vrot.lane.b32.xlu1 %v509_v56, %s1747_s30  ;;  %486 = vrot.lane.b32.xlu2 %v1680_v57, %s1746_s29 }
 0x1d0   : > { %v493_v59 = vpop.permute.xlu1 %492  ;;  %v481_v60 = vpop.permute.xlu0 %480 }
 0x1d1   : > { %v510_v62 = vmul.f32 %v493_v59, %v399_v36  ;;  %v504_v63 = vmul.f32 %v481_v60, %v1855_v8  ;;  %v574_v8 = vld [vmem:[#allocation3 + $0x28] sm:$0xff] }
 0x1d3   : > { %534 = vrot.lane.b32.xlu1 %v511_v61, %s1747_s30  ;;  %532 = vrot.lane.b32.xlu0 %v510_v62, %s1747_s30 }
 0x1d4   : > { %520 = vrot.lane.b32.xlu2 %v504_v63, %s1747_s30 }
 0x1d8   : > { %v483_v33 = vpop.permute.xlu1 %482 }
 0x1d9   : > { %v505_v0 = vmul.f32 %v483_v33, %v1862_v17  ;;  %v485_v1 = vpop.permute.xlu0 %484  ;;  %v1968_v17 = vld [vmem:[%s2352_s1 + $0x178] sm:$0xff] }
 0x1da   : > { %v506_v2 = vmul.f32 %v485_v1, %v339_v38  ;;  %630 = vmatpush.msra.mxu2 %v1968_v17  ;;  %1007 = vmatpush.msrb.mxu0 %v1968_v17  ;;  %v193_v38 = vld [vmem:[%s2352_s1 + $0x118] sm:$0xff] }
 0x1db   : > { %522 = vrot.lane.b32.xlu0 %v505_v0, %s1747_s30  ;;  %1061 = vmatpush.msra.mxu3 %v193_v38 }
 0x1dc   : > { %524 = vrot.lane.b32.xlu1 %v506_v2, %s1747_s30  ;;  %631 = vmatpush.msra.mxu2 %v1980_v7 }
 0x1dd   : > { %1008 = vmatpush.msrb.mxu0 %v1980_v7  ;;  %1062 = vmatpush.msra.mxu3 %v191_v41 }
 0x1de   : > { %632 = vmatpush.msra.mxu2 %v1990_v11 }
 0x1df   : > { %1009 = vmatpush.msrb.mxu0 %v1990_v11  ;;  %1250 = vmatpush.msrb.mxu3 %v196_v22 }
 0x1e0   : > { %633 = vmatpush.msra.mxu2 %v2003_v13 }
 0x1e1   : > { %1010 = vmatpush.msrb.mxu0 %v2003_v13 }
 0x1e2   : > { %984 = vmatpush.msrb.mxu2 %v1963_v5 }
 0x1e3   : > { %862 = vrot.lane.b32.xlu0 %v575_v3, %s1746_s29 }
 0x1e4   : > { %864 = vrot.lane.b32.xlu1 %v576_v4, %s1746_s29  ;;  %985 = vmatpush.msrb.mxu2 %v1973_v6 }
 0x1e6   : > { %986 = vmatpush.msrb.mxu2 %v1985_v10 }
 0x1e8   : > { %987 = vmatpush.msrb.mxu2 %v1998_v12 }
 0x1eb   : > { %860 = vrot.lane.b32.xlu0 %v574_v8, %s1746_s29 }
 0x21d   : > { %v529_v14 = vpop.permute.xlu2 %528 }
 0x21e   : > { %549 = vst.msk [vmem:[#allocation2 + $0x20] sm:$0xff] %vm544_vm4, %v529_v14 }
 0x225   : > { %v487_v15 = vpop.permute.xlu2 %486  ;;  %v2017_v16 = vld [vmem:[#allocation2 + $0x20] sm:$0xff] }
 0x226   : > { %v507_v18 = vmul.f32 %v487_v15, %v1871_v31  ;;  %1548 = vmatmul.msk.f32.vlgmr.msra.gmra.mxu1 %vm544_vm4, %v2017_v16  ;;  %1552 = vmatmul.msk.f32.vlgmr.msra.gmra.mxu2 %vm544_vm4, %v2017_v16  ;;  %v194_v31 = vld [vmem:[%s2352_s1 + $0x120] sm:$0xff] }
 0x227   : > { %1036 = vmatpush.msra.mxu2 %v196_v22  ;;  %672 = vmatpush.msrb.mxu1 %v194_v31 }
 0x228   : > { %526 = vrot.lane.b32.xlu2 %v507_v18, %s1747_s30  ;;  %1251 = vmatpush.msrb.mxu3 %v194_v31  ;;  %v571_v18 = vld [vmem:[#allocation3 + $0x10] sm:$0xff] }
 0x229   : > { %1037 = vmatpush.msra.mxu2 %v194_v31  ;;  %673 = vmatpush.msrb.mxu1 %v192_v23 }
 0x22a   : > { %1252 = vmatpush.msrb.mxu3 %v192_v23 }
 0x22b   : > { %1038 = vmatpush.msra.mxu2 %v192_v23  ;;  %674 = vmatpush.msrb.mxu1 %v190_v24 }
 0x22c   : > { %1253 = vmatpush.msrb.mxu3 %v190_v24 }
 0x22d   : > { %1039 = vmatpush.msra.mxu2 %v190_v24  ;;  %700 = vmatpush.msra.mxu1 %v197_v34 }
 0x22e   : > { %v521_v20 = vpop.permute.xlu2 %520 }
 0x22f   : > { %545 = vst.msk [vmem:[#allocation2] sm:$0xff] %vm544_vm4, %v521_v20  ;;  %701 = vmatpush.msra.mxu1 %v195_v35 }
 0x230   : > { %858 = vrot.lane.b32.xlu2 %v573_v21, %s1746_s29 }
 0x231   : > { %702 = vmatpush.msra.mxu1 %v193_v38 }
 0x233   : > { %703 = vmatpush.msra.mxu1 %v191_v41 }
 0x236   : > { %v2068_v37 = vld [vmem:[#allocation2] sm:$0xff] }
 0x23d   : > { %v531_v25 = vpop.permute.xlu1 %530 }
 0x23e   : > { %550 = vst.msk [vmem:[#allocation2 + $0x28] sm:$0xff] %vm544_vm4, %v531_v25 }
 0x245   : > { %v535_v26 = vpop.permute.xlu1 %534  ;;  %v533_v27 = vpop.permute.xlu0 %532  ;;  %v2040_v28 = vld [vmem:[#allocation2 + $0x28] sm:$0xff] }
 0x246   : > { %552 = vst.msk [vmem:[#allocation2 + $0x38] sm:$0xff] %vm544_vm4, %v535_v26  ;;  %1549 = vmatmul.msk.f32.gmra.mxu1 %vm544_vm4, %v2040_v28  ;;  %1553 = vmatmul.msk.f32.gmra.mxu2 %vm544_vm4, %v2040_v28 }
 0x247   : > { %551 = vst.msk [vmem:[#allocation2 + $0x30] sm:$0xff] %vm544_vm4, %v533_v27 }
 0x24d   : > { %v523_v29 = vpop.permute.xlu0 %522  ;;  %v2062_v36 = vld [vmem:[#allocation2 + $0x38] sm:$0xff] }
 0x24e   : > { %v525_v30 = vpop.permute.xlu1 %524  ;;  %546 = vst.msk [vmem:[#allocation2 + $0x8] sm:$0xff] %vm544_vm4, %v523_v29  ;;  %v2049_v32 = vld [vmem:[#allocation2 + $0x30] sm:$0xff] }
 0x24f   : > { %547 = vst.msk [vmem:[#allocation2 + $0x10] sm:$0xff] %vm544_vm4, %v525_v30  ;;  %1550 = vmatmul.msk.f32.gmra.mxu1 %vm544_vm4, %v2049_v32  ;;  %1554 = vmatmul.msk.f32.gmra.mxu2 %vm544_vm4, %v2049_v32 }
 0x255   : > { %v2075_v39 = vld [vmem:[#allocation2 + $0x8] sm:$0xff]  ;;  %v863_v14 = vpop.permute.xlu0 %862 }
 0x256   : > { %v2083_v42 = vld [vmem:[#allocation2 + $0x10] sm:$0xff] }
 0x257   : > { %1551 = vmatmul.msk.f32.gmra.mxu1 %vm544_vm4, %v2062_v36  ;;  %1555 = vmatmul.msk.f32.gmra.mxu2 %vm544_vm4, %v2062_v36 }
 0x25f   : > { %1556 = vmatmul.msk.f32.vlgmr.msrb.gmra.mxu1 %vm544_vm4, %v2068_v37 }
 0x260   : > { %1207 = vmatpush.msrb.mxu1 %v1963_v5 }
 0x262   : > { %1208 = vmatpush.msrb.mxu1 %v1973_v6 }
 0x264   : > { %1209 = vmatpush.msrb.mxu1 %v1985_v10 }
 0x266   : > { %1210 = vmatpush.msrb.mxu1 %v1998_v12 }
 0x267   : > { %1557 = vmatmul.msk.f32.gmra.mxu1 %vm544_vm4, %v2075_v39 }
 0x26f   : > { %1558 = vmatmul.msk.f32.gmra.mxu1 %vm544_vm4, %v2083_v42 }
 0x282   : > { %v527_v44 = vpop.permute.xlu2 %526 }
 0x283   : > { %548 = vst.msk [vmem:[#allocation2 + $0x18] sm:$0xff] %vm544_vm4, %v527_v44 }
 0x28a   : > { %v2091_v45 = vld [vmem:[#allocation2 + $0x18] sm:$0xff] }
 0x28b   : > { %1559 = vmatmul.msk.f32.gmra.mxu1 %vm544_vm4, %v2091_v45 }
 0x293   : > { %1560 = vmatmul.msk.f32.vlgmr.msra.gmra.mxu1 %vm544_vm4, %v2068_v37 }
 0x294   : > { %1270 = vmatpush.msra.mxu1 %v197_v34 }
 0x296   : > { %1271 = vmatpush.msra.mxu1 %v195_v35 }
 0x298   : > { %1272 = vmatpush.msra.mxu1 %v193_v38 }
 0x29a   : > { %1273 = vmatpush.msra.mxu1 %v191_v41 }
 0x29b   : > { %1561 = vmatmul.msk.f32.gmra.mxu1 %vm544_vm4, %v2075_v39 }
 0x2a3   : > { %1562 = vmatmul.msk.f32.gmra.mxu1 %vm544_vm4, %v2083_v42  ;;  %v606_v40 = vpop.f32.mrf.mxu1 }
 0x2a9   : > { %v2115_v15 = vpop.f32.mrf.mxu2 }
 0x2ab   : > { %1563 = vmatmul.msk.f32.gmra.mxu1 %vm544_vm4, %v2091_v45 }
 0x2c3   : > { %v609_v43 = vpop.f32.mrf.mxu1 }
 0x2c9   : > { %v2126_v26 = vpop.f32.mrf.mxu2 }
 0x2cc   : > { %v612_v46 = vpop.f32.mrf.mxu1 }
 0x2d2   : > { %v641_v44 = vpop.f32.mrf.mxu2 }
 0x2d4   : > { %v615_v47 = vpop.f32.mrf.mxu1 }
 0x2dc   : > { %v676_v49 = vpop.f32.mrf.mxu1 }
 0x2dd   : > { %v677_v19 = vadd.f32 %v676_v49, %v606_v40 }
 0x2df   : > { %v722_v57 = vadd.f32 %v2109_v9, %v677_v19 }
 0x2e1   : > { %v1564_v58 = vmul.f32 -1.442695, %v722_v57 }
 0x2e4   : > { %v679_v50 = vpop.f32.mrf.mxu1 }
 0x2e5   : > { %v680_v59 = vadd.f32 %v679_v50, %v609_v43  ;;  %v2137_v50 = vperm.slane %v2106_v48, 1 }
 0x2e7   : > { %v724_v62 = vadd.f32 %v2109_v9, %v680_v59  ;;  %v865_v59 = vpop.permute.xlu1 %864 }
 0x2e9   : > { %v1565_v2 = vmul.f32 -1.442695, %v724_v62  ;;  %v644_v62 = vpop.f32.mrf.mxu2 }
 0x2ec   : > { %v682_v52 = vpop.f32.mrf.mxu1 }
 0x2ed   : > { %v683_v51 = vadd.f32 %v682_v52, %v612_v46 }
 0x2ef   : > { %v726_v53 = vadd.f32 %v2109_v9, %v683_v51 }
 0x2f1   : > { %v1566_v54 = vmul.f32 -1.442695, %v726_v53 }
 0x2f3   : > { %1681 = vpow2.f32 %v1566_v54 }
 0x2f9   : > { %v1682_v55 = vpop.eup %1681 }
 0x2fa   : > { %v744_v56 = vadd.f32 1.0, %v1682_v55 }
 0x2fc   : > { %1683 = vrcp.f32 %v744_v56  ;;  %v787_v33 = vand.u32 2147483648, %v744_v56  ;;  %v785_v1 = vand.u32 2147483647, %v744_v56  ;;  %vm781_vm3 = vweird.f32 %v744_v56 }
 0x2fd   : > { %1685 = vpow2.f32 %v1564_v58 }
 0x2fe   : > { %v788_v6 = vor.u32 1.1754944e-38, %v787_v33  ;;  %vm786_vm6 = vcmp.eq.f32.partialorder %v785_v1, 8.507059e+37  ;;  %1687 = vpow2.f32 %v1565_v2  ;;  %v572_v33 = vld [vmem:[#allocation3 + $0x18] sm:$0xff] }
 0x302   : > { %v1684_v60 = vpop.eup %1683 }
 0x303   : > { %v777_v61 = vmul.f32 %v1684_v60, %v744_v56  ;;  %vm782_vm2 = vweird.f32 %v1684_v60  ;;  %v1686_v5 = vpop.eup %1685 }
 0x304   : > { %vm783_vm5 = vmor %vm781_vm3, %vm782_vm2  ;;  %v2119_v21 = vadd.f32 1.0, %v1686_v5  ;;  %v1688_v25 = vpop.eup %1687 }
 0x305   : > { %v778_v63 = vsub.f32 1.0, %v777_v61  ;;  %v2128_v29 = vadd.f32 1.0, %v1688_v25 }
 0x306   : > { %vm751_vm12 = vweird.f32 %v2119_v21  ;;  %v757_v1 = vand.u32 2147483648, %v2119_v21 }
 0x307   : > { %v779_v0 = vmul.f32 %v1684_v60, %v778_v63  ;;  %vm766_vm0 = vweird.f32 %v2128_v29  ;;  %v772_v25 = vand.u32 2147483648, %v2128_v29 }
 0x308   : > { %v685_v3 = vpop.f32.mrf.mxu1 }
 0x309   : > { %v686_v4 = vadd.f32 %v685_v3, %v615_v47  ;;  %v780_v8 = vadd.f32 %v1684_v60, %v779_v0 }
 0x30b   : > { %v728_v10 = vadd.f32 %v2109_v9, %v686_v4  ;;  %v784_v12 = vsel %vm783_vm5, %v1684_v60, %v780_v8  ;;  %v755_v8 = vand.u32 2147483647, %v2119_v21 }
 0x30c   : > { %v2117_v20 = vsel %vm786_vm6, %v788_v6, %v784_v12 }
 0x30d   : > { %v1567_v22 = vmul.f32 -1.442695, %v728_v10  ;;  %v832_v31 = vmul.f32 %v2117_v20, %v571_v18  ;;  %v872_v23 = vmul.f32 %v863_v14, %v2117_v20  ;;  %v758_v14 = vor.u32 1.1754944e-38, %v757_v1 }
 0x30e   : > { %vm756_vm14 = vcmp.eq.f32.partialorder %v755_v8, 8.507059e+37 }
 0x30f   : > { %1689 = vpow2.f32 %v1567_v22  ;;  %842 = vrot.lane.b32.xlu2 %v832_v31, %s1745_s28  ;;  %882 = vrot.lane.b32.xlu0 %v872_v23, %s1746_s29  ;;  %v859_v31 = vpop.permute.xlu2 %858  ;;  %v569_v23 = vld [vmem:[#allocation3] sm:$0xff] }
 0x310   : > { %v705_v24 = vpop.f32.mrf.mxu1  ;;  %1691 = vrcp.f32 %v2119_v21 }
 0x311   : > { %v706_v18 = vadd.f32 %v705_v24, %v2115_v15  ;;  %v770_v24 = vand.u32 2147483647, %v2128_v29 }
 0x313   : > { %vm771_vm2 = vcmp.eq.f32.partialorder %v770_v24, 8.507059e+37 }
 0x315   : > { %v1690_v27 = vpop.eup %1689 }
 0x316   : > { %v745_v30 = vadd.f32 1.0, %v1690_v27  ;;  %v1692_v34 = vpop.eup %1691  ;;  %v723_v27 = vadd.f32 %v2137_v50, %v706_v18 }
 0x317   : > { %v747_v38 = vmul.f32 %v1692_v34, %v2119_v21  ;;  %vm752_vm10 = vweird.f32 %v1692_v34 }
 0x318   : > { %1693 = vrcp.f32 %v745_v30  ;;  %v2130_v35 = vpop.f32.mrf.mxu1  ;;  %v802_v53 = vand.u32 2147483648, %v745_v30  ;;  %v800_v56 = vand.u32 2147483647, %v745_v30  ;;  %vm796_vm8 = vweird.f32 %v745_v30  ;;  %vm753_vm13 = vmor %vm751_vm12, %vm752_vm10 }
 0x319   : > { %1695 = vrcp.f32 %v2128_v29  ;;  %v748_v40 = vsub.f32 1.0, %v747_v38 }
 0x31a   : > { %v803_v58 = vor.u32 1.1754944e-38, %v802_v53  ;;  %vm801_vm11 = vcmp.eq.f32.partialorder %v800_v56, 8.507059e+37 }
 0x31b   : > { %v749_v54 = vmul.f32 %v1692_v34, %v748_v40 }
 0x31d   : > { %v750_v61 = vadd.f32 %v1692_v34, %v749_v54 }
 0x31e   : > { %v1694_v41 = vpop.eup %1693 }
 0x31f   : > { %v2134_v43 = vpop.eup %1695  ;;  %v792_v46 = vmul.f32 %v1694_v41, %v745_v30  ;;  %vm797_vm7 = vweird.f32 %v1694_v41  ;;  %v754_v10 = vsel %vm753_vm13, %v1692_v34, %v750_v61 }
 0x320   : > { %v711_v47 = vpop.f32.mrf.mxu1  ;;  %v762_v51 = vmul.f32 %v2134_v43, %v2128_v29  ;;  %vm798_vm9 = vmor %vm796_vm8, %vm797_vm7  ;;  %v2156_v21 = vsel %vm756_vm14, %v758_v14, %v754_v10  ;;  %vm767_vm15 = vweird.f32 %v2134_v43 }
 0x321   : > { %v793_v49 = vsub.f32 1.0, %v792_v46  ;;  %v712_v52 = vadd.f32 %v711_v47, %v641_v44  ;;  %v830_v30 = vmul.f32 %v2156_v21, %v569_v23  ;;  %v870_v15 = vmul.f32 %v859_v31, %v2156_v21  ;;  %vm768_vm1 = vmor %vm766_vm0, %vm767_vm15  ;;  %v861_v46 = vpop.permute.xlu0 %860  ;;  %v570_v47 = vld [vmem:[#allocation3 + $0x8] sm:$0xff] }
 0x322   : > { %v763_v48 = vsub.f32 1.0, %v762_v51  ;;  %v709_v44 = vadd.f32 %v2130_v35, %v2126_v26 }
 0x323   : > { %v727_v19 = vadd.f32 %v2137_v50, %v712_v52  ;;  %v794_v55 = vmul.f32 %v1694_v41, %v793_v49 }
 0x324   : > { %v764_v12 = vmul.f32 %v2134_v43, %v763_v48  ;;  %v725_v29 = vadd.f32 %v2137_v50, %v709_v44 }
 0x325   : > { %1697 = vtanh.f32 %v727_v19  ;;  %v795_v57 = vadd.f32 %v1694_v41, %v794_v55 }
 0x326   : > { %v765_v22 = vadd.f32 %v2134_v43, %v764_v12 }
 0x327   : > { %v799_v60 = vsel %vm798_vm9, %v1694_v41, %v795_v57  ;;  %v773_v41 = vor.u32 1.1754944e-38, %v772_v25 }
 0x328   : > { %v714_v63 = vpop.f32.mrf.mxu1  ;;  %v2142_v0 = vsel %vm801_vm11, %v803_v58, %v799_v60  ;;  %v769_v38 = vsel %vm768_vm1, %v2134_v43, %v765_v22 }
 0x329   : > { %v715_v2 = vadd.f32 %v714_v63, %v644_v62  ;;  %v833_v3 = vmul.f32 %v2142_v0, %v572_v33  ;;  %v873_v4 = vmul.f32 %v865_v59, %v2142_v0  ;;  %v774_v40 = vsel %vm771_vm2, %v773_v41, %v769_v38 }
 0x32a   : > { %v831_v49 = vmul.f32 %v774_v40, %v570_v47  ;;  %v871_v52 = vmul.f32 %v861_v46, %v774_v40 }
 0x32b   : > { %v1698_v5 = vpop.eup %1697  ;;  %v729_v6 = vadd.f32 %v2137_v50, %v715_v2  ;;  %844 = vrot.lane.b32.xlu2 %v833_v3, %s1745_s28  ;;  %884 = vrot.lane.b32.xlu0 %v873_v4, %s1746_s29 }
 0x32c   : > { %818 = vrot.lane.b32.xlu1 %v1698_v5, %s1745_s28 }
 0x32d   : > { %1699 = vtanh.f32 %v729_v6 }
 0x32e   : > { %1701 = vtanh.f32 %v723_v27 }
 0x32f   : > { %1703 = vtanh.f32 %v725_v29 }
 0x333   : > { %v1700_v34 = vpop.eup %1699  ;;  %838 = vrot.lane.b32.xlu2 %v830_v30, %s1745_s28  ;;  %878 = vrot.lane.b32.xlu0 %v870_v15, %s1746_s29 }
 0x334   : > { %820 = vrot.lane.b32.xlu1 %v1700_v34, %s1745_s28  ;;  %v1702_v51 = vpop.eup %1701 }
 0x335   : > { %v1704_v43 = vpop.eup %1703 }
 0x33b   : > { %840 = vrot.lane.b32.xlu2 %v831_v49, %s1745_s28  ;;  %880 = vrot.lane.b32.xlu0 %v871_v52, %s1746_s29 }
 0x33c   : > { %814 = vrot.lane.b32.xlu1 %v1702_v51, %s1745_s28 }
 0x344   : > { %816 = vrot.lane.b32.xlu1 %v1704_v43, %s1745_s28 }
 0x369   : > { %v843_v26 = vpop.permute.xlu2 %842 }
 0x381   : > { %v883_v35 = vpop.permute.xlu0 %882 }
 0x385   : > { %v845_v56 = vpop.permute.xlu2 %844 }
 0x38d   : > { %v839_v62 = vpop.permute.xlu2 %838 }
 0x395   : > { %v841_v6 = vpop.permute.xlu2 %840 }
 0x39d   : > { %v885_v57 = vpop.permute.xlu0 %884 }
 0x39e   : > { %v819_v53 = vpop.permute.xlu1 %818 }
 0x39f   : > { %v828_v54 = vmul.f32 %v819_v53, %v2117_v20 }
 0x3a1   : > { %v852_v19 = vadd.f32 %v843_v26, %v828_v54 }
 0x3a3   : > { %v892_v55 = vadd.f32 %v883_v35, %v852_v19 }
 0x3a5   : > { %1705 = vtanh.f32 %v892_v55  ;;  %v879_v1 = vpop.permute.xlu0 %878 }
 0x3a6   : > { %v821_v58 = vpop.permute.xlu1 %820 }
 0x3a7   : > { %v829_v59 = vmul.f32 %v821_v58, %v2142_v0 }
 0x3a9   : > { %v853_v48 = vadd.f32 %v845_v56, %v829_v59 }
 0x3ab   : > { %v1706_v60 = vpop.eup %1705  ;;  %v893_v61 = vadd.f32 %v885_v57, %v853_v48 }
 0x3ac   : > { %906 = vrot.lane.b32.xlu1 %v1706_v60, %s1746_s29 }
 0x3ad   : > { %1707 = vtanh.f32 %v893_v61  ;;  %v881_v12 = vpop.permute.xlu0 %880 }
 0x3ae   : > { %v815_v63 = vpop.permute.xlu1 %814 }
 0x3af   : > { %v826_v33 = vmul.f32 %v815_v63, %v2156_v21 }
 0x3b1   : > { %v850_v2 = vadd.f32 %v839_v62, %v826_v33 }
 0x3b3   : > { %v1708_v3 = vpop.eup %1707  ;;  %v890_v4 = vadd.f32 %v879_v1, %v850_v2 }
 0x3b4   : > { %908 = vrot.lane.b32.xlu2 %v1708_v3, %s1746_s29 }
 0x3b5   : > { %1709 = vtanh.f32 %v890_v4 }
 0x3b6   : > { %v817_v8 = vpop.permute.xlu1 %816 }
 0x3b7   : > { %v827_v5 = vmul.f32 %v817_v8, %v774_v40 }
 0x3b9   : > { %v851_v10 = vadd.f32 %v841_v6, %v827_v5 }
 0x3bb   : > { %v1710_v14 = vpop.eup %1709  ;;  %v891_v18 = vadd.f32 %v881_v12, %v851_v10 }
 0x3bc   : > { %902 = vrot.lane.b32.xlu0 %v1710_v14, %s1746_s29 }
 0x3bd   : > { %1711 = vtanh.f32 %v891_v18 }
 0x3c3   : > { %v1712_v22 = vpop.eup %1711 }
 0x3c4   : > { %904 = vrot.lane.b32.xlu1 %v1712_v22, %s1746_s29 }
 0x40e   : > { %v909_v31 = vpop.permute.xlu2 %908 }
 0x40f   : > { %v917_v23 = vmul.f32 %v909_v31, %v2142_v0 }
 0x411   : > { %928 = vrot.lane.b32.xlu0 %v917_v23, %s1746_s29 }
 0x419   : > { %946 = vrot.lane.b32.xlu0 %v892_v55, %s1745_s28 }
 0x41e   : > { %v907_v25 = vpop.permute.xlu1 %906 }
 0x41f   : > { %v916_v27 = vmul.f32 %v907_v25, %v2117_v20 }
 0x421   : > { %926 = vrot.lane.b32.xlu2 %v916_v27, %s1746_s29  ;;  %944 = vrot.lane.b32.xlu0 %v891_v18, %s1745_s28 }
 0x42e   : > { %v903_v30 = vpop.permute.xlu0 %902 }
 0x42f   : > { %v914_v15 = vmul.f32 %v903_v30, %v2156_v21 }
 0x431   : > { %922 = vrot.lane.b32.xlu1 %v914_v15, %s1746_s29 }
 0x436   : > { %v905_v24 = vpop.permute.xlu1 %904 }
 0x437   : > { %v915_v34 = vmul.f32 %v905_v24, %v774_v40 }
 0x439   : > { %924 = vrot.lane.b32.xlu2 %v915_v34, %s1746_s29  ;;  %948 = vrot.lane.b32.xlu1 %v893_v61, %s1745_s28 }
 0x441   : > { %942 = vrot.lane.b32.xlu2 %v890_v4, %s1745_s28 }
 0x47b   : > { %v927_v0 = vpop.permute.xlu2 %926 }
 0x47c   : > { %936 = vst.msk [vmem:[#allocation2 + $0x50] sm:$0xff] %vm544_vm4, %v927_v0 }
 0x483   : > { %v929_v20 = vpop.permute.xlu0 %928  ;;  %v2196_v38 = vld [vmem:[#allocation2 + $0x50] sm:$0xff] }
 0x484   : > { %937 = vst.msk [vmem:[#allocation2 + $0x58] sm:$0xff] %vm544_vm4, %v929_v20  ;;  %1568 = vmatmul.msk.f32.vlgmr.msrb.gmra.mxu2 %vm544_vm4, %v2196_v38  ;;  %1570 = vmatmul.msk.f32.vlgmr.msrb.gmra.mxu0 %vm544_vm4, %v2196_v38 }
 0x485   : > { %1227 = vmatpush.msrb.mxu2 %v1968_v17 }
 0x487   : > { %1228 = vmatpush.msrb.mxu2 %v1980_v7 }
 0x489   : > { %1229 = vmatpush.msrb.mxu2 %v1990_v11 }
 0x48b   : > { %v947_v21 = vpop.permute.xlu0 %946  ;;  %v2206_v41 = vld [vmem:[#allocation2 + $0x58] sm:$0xff]  ;;  %1230 = vmatpush.msrb.mxu2 %v2003_v13 }
 0x48c   : > { %956 = vst.msk [vmem:[#allocation3 + $0x50] sm:$0xff] %vm544_vm4, %v947_v21  ;;  %1569 = vmatmul.msk.f32.gmra.mxu2 %vm544_vm4, %v2206_v41  ;;  %1571 = vmatmul.msk.f32.gmra.mxu0 %vm544_vm4, %v2206_v41 }
 0x493   : > { %v925_v44 = vpop.permute.xlu2 %924  ;;  %v945_v40 = vpop.permute.xlu0 %944  ;;  %v964_v17 = vld [vmem:[#allocation3 + $0x50] sm:$0xff] }
 0x494   : > { %935 = vst.msk [vmem:[#allocation2 + $0x48] sm:$0xff] %vm544_vm4, %v925_v44  ;;  %1138 = vrot.lane.b32.xlu1 %v964_v17, %s1746_s29 }
 0x495   : > { %955 = vst.msk [vmem:[#allocation3 + $0x48] sm:$0xff] %vm544_vm4, %v945_v40 }
 0x49b   : > { %v943_v7 = vpop.permute.xlu2 %942  ;;  %v2226_v47 = vld [vmem:[#allocation2 + $0x48] sm:$0xff] }
 0x49c   : > { %954 = vst.msk [vmem:[#allocation3 + $0x40] sm:$0xff] %vm544_vm4, %v943_v7 }
 0x4a3   : > { %v923_v11 = vpop.permute.xlu1 %922  ;;  %v962_v27 = vld [vmem:[#allocation3 + $0x40] sm:$0xff] }
 0x4a4   : > { %934 = vst.msk [vmem:[#allocation2 + $0x40] sm:$0xff] %vm544_vm4, %v923_v11 }
 0x4ab   : > { %v949_v13 = vpop.permute.xlu1 %948  ;;  %v2219_v46 = vld [vmem:[#allocation2 + $0x40] sm:$0xff] }
 0x4ac   : > { %957 = vst.msk [vmem:[#allocation3 + $0x58] sm:$0xff] %vm544_vm4, %v949_v13  ;;  %1572 = vmatmul.msk.f32.vlgmr.msra.gmra.mxu2 %vm544_vm4, %v2219_v46  ;;  %1574 = vmatmul.msk.f32.vlgmr.msra.gmra.mxu3 %vm544_vm4, %v2219_v46 }
 0x4b3   : > { %v965_v29 = vld [vmem:[#allocation3 + $0x58] sm:$0xff] }
 0x4b4   : > { %1575 = vmatmul.msk.f32.gmra.mxu3 %vm544_vm4, %v2226_v47  ;;  %1140 = vrot.lane.b32.xlu2 %v965_v29, %s1746_s29  ;;  %v963_v29 = vld [vmem:[#allocation3 + $0x48] sm:$0xff] }
 0x4b5   : > { %1573 = vmatmul.msk.f32.gmra.mxu2 %vm544_vm4, %v2226_v47 }
 0x501   : > { %v1012_v51 = vpop.f32.mrf.mxu0 }
 0x506   : > { %v1139_v25 = vpop.permute.xlu1 %1138 }
 0x507   : > { %v989_v49 = vpop.f32.mrf.mxu2 }
 0x509   : > { %v1015_v56 = vpop.f32.mrf.mxu0 }
 0x50e   : > { %v1141_v11 = vpop.permute.xlu2 %1140 }
 0x50f   : > { %v992_v52 = vpop.f32.mrf.mxu2 }
 0x52f   : > { %v1041_v43 = vpop.f32.mrf.mxu2  ;;  %v1064_v26 = vpop.f32.mrf.mxu3 }
 0x530   : > { %v1042_v35 = vadd.f32 %v1041_v43, %v989_v49  ;;  %v1065_v53 = vadd.f32 %v1064_v26, %v1012_v51 }
 0x532   : > { %v1070_v54 = vadd.f32 %v1042_v35, %v2109_v9  ;;  %v1071_v19 = vadd.f32 %v1065_v53, %v2137_v50 }
 0x534   : > { %v1576_v55 = vmul.f32 -1.442695, %v1070_v54  ;;  %1713 = vtanh.f32 %v1071_v19 }
 0x536   : > { %1715 = vpow2.f32 %v1576_v55 }
 0x537   : > { %v1067_v57 = vpop.f32.mrf.mxu3 }
 0x538   : > { %v1044_v58 = vpop.f32.mrf.mxu2  ;;  %v1068_v59 = vadd.f32 %v1067_v57, %v1015_v56 }
 0x539   : > { %v1045_v48 = vadd.f32 %v1044_v58, %v992_v52 }
 0x53a   : > { %v1714_v60 = vpop.eup %1713  ;;  %v1073_v61 = vadd.f32 %v1068_v59, %v2137_v50 }
 0x53b   : > { %v1072_v62 = vadd.f32 %v1045_v48, %v2109_v9  ;;  %1116 = vrot.lane.b32.xlu0 %v1714_v60, %s1745_s28 }
 0x53c   : > { %v1716_v63 = vpop.eup %1715  ;;  %1717 = vtanh.f32 %v1073_v61 }
 0x53d   : > { %v1080_v33 = vadd.f32 1.0, %v1716_v63  ;;  %v1577_v1 = vmul.f32 -1.442695, %v1072_v62 }
 0x53f   : > { %1719 = vrcp.f32 %v1080_v33  ;;  %v1093_v10 = vand.u32 2147483648, %v1080_v33  ;;  %v1091_v14 = vand.u32 2147483647, %v1080_v33  ;;  %vm1087_vm5 = vweird.f32 %v1080_v33 }
 0x540   : > { %1721 = vpow2.f32 %v1577_v1 }
 0x541   : > { %v1094_v22 = vor.u32 1.1754944e-38, %v1093_v10  ;;  %vm1092_vm7 = vcmp.eq.f32.partialorder %v1091_v14, 8.507059e+37 }
 0x542   : > { %v1718_v2 = vpop.eup %1717 }
 0x543   : > { %1118 = vrot.lane.b32.xlu0 %v1718_v2, %s1745_s28 }
 0x545   : > { %v1720_v3 = vpop.eup %1719 }
 0x546   : > { %v1722_v4 = vpop.eup %1721  ;;  %v1083_v8 = vmul.f32 %v1720_v3, %v1080_v33  ;;  %vm1088_vm3 = vweird.f32 %v1720_v3 }
 0x547   : > { %v1081_v5 = vadd.f32 1.0, %v1722_v4  ;;  %vm1089_vm6 = vmor %vm1087_vm5, %vm1088_vm3  ;;  %v208_v4 = vld [vmem:[%s2352_s1 + $0x1a0] sm:$0xff] }
 0x548   : > { %v1084_v6 = vsub.f32 1.0, %v1083_v8  ;;  %v207_v8 = vld [vmem:[%s2352_s1 + $0x190] sm:$0xff] }
 0x549   : > { %1723 = vrcp.f32 %v1081_v5  ;;  %v1108_v20 = vand.u32 2147483648, %v1081_v5  ;;  %v1106_v44 = vand.u32 2147483647, %v1081_v5  ;;  %vm1102_vm9 = vweird.f32 %v1081_v5 }
 0x54a   : > { %v1085_v12 = vmul.f32 %v1720_v3, %v1084_v6 }
 0x54b   : > { %v1109_v17 = vor.u32 1.1754944e-38, %v1108_v20  ;;  %vm1107_vm11 = vcmp.eq.f32.partialorder %v1106_v44, 8.507059e+37 }
 0x54c   : > { %v1086_v18 = vadd.f32 %v1720_v3, %v1085_v12 }
 0x54e   : > { %v1090_v31 = vsel %vm1089_vm6, %v1720_v3, %v1086_v18  ;;  %v209_v3 = vld [vmem:[%s2352_s1 + $0x1b0] sm:$0xff] }
 0x54f   : > { %v1724_v23 = vpop.eup %1723  ;;  %v1095_v30 = vsel %vm1092_vm7, %v1094_v22, %v1090_v31  ;;  %1600 = vmatpush.msra.mxu3 %v209_v3  ;;  %1410 = vmatpush.msra.mxu2 %v209_v3 }
 0x550   : > { %v1098_v15 = vmul.f32 %v1724_v23, %v1081_v5  ;;  %v1124_v24 = vmul.f32 %v1095_v30, %v962_v27  ;;  %v1144_v34 = vmul.f32 %v1139_v25, %v1095_v30  ;;  %vm1103_vm8 = vweird.f32 %v1724_v23  ;;  %v206_v5 = vld [vmem:[%s2352_s1 + $0x180] sm:$0xff] }
 0x551   : > { %vm1104_vm10 = vmor %vm1102_vm9, %vm1103_vm8  ;;  %1601 = vmatpush.msra.mxu3 %v208_v4  ;;  %1411 = vmatpush.msra.mxu2 %v208_v4 }
 0x552   : > { %v1099_v0 = vsub.f32 1.0, %v1098_v15  ;;  %1128 = vrot.lane.b32.xlu1 %v1124_v24, %s1745_s28  ;;  %1148 = vrot.lane.b32.xlu2 %v1144_v34, %s1746_s29 }
 0x553   : > { %1602 = vmatpush.msra.mxu3 %v207_v8  ;;  %1412 = vmatpush.msra.mxu2 %v207_v8 }
 0x554   : > { %v1100_v21 = vmul.f32 %v1724_v23, %v1099_v0 }
 0x555   : > { %1603 = vmatpush.msra.mxu3 %v206_v5  ;;  %1413 = vmatpush.msra.mxu2 %v206_v5 }
 0x556   : > { %v1101_v40 = vadd.f32 %v1724_v23, %v1100_v21 }
 0x558   : > { %v1105_v7 = vsel %vm1104_vm10, %v1724_v23, %v1101_v40 }
 0x559   : > { %v1110_v13 = vsel %vm1107_vm11, %v1109_v17, %v1105_v7 }
 0x55a   : > { %v1145_v49 = vmul.f32 %v1141_v11, %v1110_v13  ;;  %v1125_v52 = vmul.f32 %v1110_v13, %v963_v29 }
 0x55c   : > { %1150 = vrot.lane.b32.xlu2 %v1145_v49, %s1746_s29  ;;  %1130 = vrot.lane.b32.xlu1 %v1125_v52, %s1745_s28 }
 0x5ac   : > { %v1149_v53 = vpop.permute.xlu2 %1148 }
 0x5ad   : > { %v1117_v51 = vpop.permute.xlu0 %1116 }
 0x5ae   : > { %v1122_v43 = vmul.f32 %v1117_v51, %v1095_v30 }
 0x5b5   : > { %v1119_v19 = vpop.permute.xlu0 %1118 }
 0x5b6   : > { %v1123_v55 = vmul.f32 %v1119_v19, %v1110_v13  ;;  %v1151_v59 = vpop.permute.xlu2 %1150 }
 0x5c4   : > { %v1129_v26 = vpop.permute.xlu1 %1128 }
 0x5c5   : > { %v1134_v35 = vadd.f32 %v1129_v26, %v1122_v43 }
 0x5c7   : > { %v1154_v54 = vadd.f32 %v1149_v53, %v1134_v35 }
 0x5c9   : > { %1725 = vtanh.f32 %v1154_v54 }
 0x5ce   : > { %v1131_v56 = vpop.permute.xlu1 %1130 }
 0x5cf   : > { %v1726_v57 = vpop.eup %1725  ;;  %v1135_v58 = vadd.f32 %v1131_v56, %v1123_v55 }
 0x5d0   : > { %1160 = vrot.lane.b32.xlu0 %v1726_v57, %s1746_s29 }
 0x5d1   : > { %v1155_v48 = vadd.f32 %v1151_v59, %v1135_v58 }
 0x5d3   : > { %1727 = vtanh.f32 %v1155_v48 }
 0x5d9   : > { %v1728_v60 = vpop.eup %1727 }
 0x5da   : > { %1162 = vrot.lane.b32.xlu1 %v1728_v60, %s1746_s29 }
 0x5e2   : > { %1182 = vrot.lane.b32.xlu1 %v1155_v48, %s1745_s28 }
 0x642   : > { %v1161_v61 = vpop.permute.xlu0 %1160 }
 0x643   : > { %v1166_v62 = vmul.f32 %v1161_v61, %v1095_v30 }
 0x645   : > { %1170 = vrot.lane.b32.xlu2 %v1166_v62, %s1746_s29 }
 0x64c   : > { %v1163_v63 = vpop.permute.xlu1 %1162 }
 0x64d   : > { %v1167_v33 = vmul.f32 %v1163_v63, %v1110_v13  ;;  %1180 = vrot.lane.b32.xlu2 %v1154_v54, %s1745_s28 }
 0x64f   : > { %1172 = vrot.lane.b32.xlu0 %v1167_v33, %s1746_s29 }
 0x654   : > { %v1183_v1 = vpop.permute.xlu1 %1182 }
 0x655   : > { %1187 = vst.msk [vmem:[#allocation3 + $0x68] sm:$0xff] %vm544_vm4, %v1183_v1 }
 0x65c   : > { %v1191_v2 = vld [vmem:[#allocation3 + $0x68] sm:$0xff] }
 0x65d   : > { %1312 = vrot.lane.b32.xlu0 %v1191_v2, %s1746_s29 }
 0x69f   : > { %v1171_v6 = vpop.permute.xlu2 %1170 }
 0x6a0   : > { %1176 = vst.msk [vmem:[#allocation2 + $0x60] sm:$0xff] %vm544_vm4, %v1171_v6 }
 0x6a7   : > { %v1181_v10 = vpop.permute.xlu2 %1180  ;;  %v1188_v12 = vld [vmem:[#allocation2 + $0x60] sm:$0xff] }
 0x6a8   : > { %1186 = vst.msk [vmem:[#allocation3 + $0x60] sm:$0xff] %vm544_vm4, %v1181_v10  ;;  %1580 = vmatmul.msk.f32.vlgmr.msrb.gmra.mxu3 %vm544_vm4, %v1188_v12 }
 0x6af   : > { %v1190_v56 = vld [vmem:[#allocation3 + $0x60] sm:$0xff] }
 0x6b0   : > { %1588 = vmatmul.msk.f32.vlgmr.msra.gmra.mxu3 %vm544_vm4, %v2040_v28 }
 0x6b8   : > { %1589 = vmatmul.msk.f32.gmra.mxu3 %vm544_vm4, %v2049_v32  ;;  %v2301_v32 = vld [vmem:[%s2353_s2 + $0x2] ss:$0 sm:$0xff] }
 0x6c0   : > { %1590 = vmatmul.msk.f32.gmra.mxu3 %vm544_vm4, %v2062_v36 }
 0x6c1   : > { %v1173_v14 = vpop.permute.xlu0 %1172 }
 0x6c2   : > { %1177 = vst.msk [vmem:[#allocation2 + $0x68] sm:$0xff] %vm544_vm4, %v1173_v14 }
 0x6c8   : > { %1591 = vmatmul.msk.f32.gmra.mxu3 %vm544_vm4, %v2219_v46 }
 0x6c9   : > { %v1189_v18 = vld [vmem:[#allocation2 + $0x68] sm:$0xff] }
 0x6ca   : > { %1578 = vmatmul.msk.f32.vlgmr.msrb.gmra.mxu1 %vm544_vm4, %v1189_v18  ;;  %1579 = vmatmul.msk.f32.vlgmr.msrb.gmra.mxu2 %vm544_vm4, %v1189_v18 }
 0x6cf   : > { %v1313_v55 = vpop.permute.xlu0 %1312 }
 0x6d0   : > { %1592 = vmatmul.msk.f32.gmra.mxu3 %vm544_vm4, %v2226_v47 }
 0x6d2   : > { %1581 = vmatmul.msk.f32.vlgmr.msra.gmra.mxu1 %vm544_vm4, %v1188_v12  ;;  %1583 = vmatmul.msk.f32.vlgmr.msra.gmra.mxu2 %vm544_vm4, %v2068_v37 }
 0x6d8   : > { %1593 = vmatmul.msk.f32.gmra.mxu3 %vm544_vm4, %v2196_v38 }
 0x6da   : > { %1584 = vmatmul.msk.f32.gmra.mxu2 %vm544_vm4, %v2075_v39 }
 0x6e0   : > { %1594 = vmatmul.msk.f32.gmra.mxu3 %vm544_vm4, %v2206_v41 }
 0x6e2   : > { %1585 = vmatmul.msk.f32.gmra.mxu2 %vm544_vm4, %v2083_v42 }
 0x6e8   : > { %1595 = vmatmul.msk.f32.gmra.mxu3 %vm544_vm4, %v1188_v12 }
 0x6ea   : > { %1586 = vmatmul.msk.f32.gmra.mxu2 %vm544_vm4, %v2091_v45 }
 0x6f0   : > { %1596 = vmatmul.msk.f32.gmra.mxu3 %vm544_vm4, %v1189_v18 }
 0x6f2   : > { %1587 = vmatmul.msk.f32.gmra.mxu2 %vm544_vm4, %v2017_v16 }
 0x72b   : > { %v1255_v28 = vpop.f32.mrf.mxu3 }
 0x733   : > { %v1430_v16 = vpop.f32.mrf.mxu3 }
 0x734   : > { %v1431_v36 = vadd.f32 %v2301_v32, %v1430_v16 }
 0x736   : > { %1465 = vst [vmem:[%s2306_s6 + $0x28] sm:$0xff] %v1431_v36 }
 0x73b   : > { %v1433_v37 = vpop.f32.mrf.mxu3 }
 0x73c   : > { %v1434_v39 = vadd.f32 %v2301_v32, %v1433_v37 }
 0x73e   : > { %1466 = vst [vmem:[%s2306_s6 + $0x30] sm:$0xff] %v1434_v39 }
 0x743   : > { %v1436_v42 = vpop.f32.mrf.mxu3 }
 0x744   : > { %v1437_v45 = vadd.f32 %v2301_v32, %v1436_v42 }
 0x746   : > { %1467 = vst [vmem:[%s2306_s6 + $0x38] sm:$0xff] %v1437_v45 }
 0x747   : > { %v1212_v38 = vpop.f32.mrf.mxu1 }
 0x748   : > { %v1256_v41 = vadd.f32 %v1255_v28, %v1212_v38 }
 0x74a   : > { %v1278_v46 = vadd.f32 %v1256_v41, %v2109_v9 }
 0x74b   : > { %v1439_v47 = vpop.f32.mrf.mxu3 }
 0x74c   : > { %v1582_v22 = vmul.f32 -1.442695, %v1278_v46  ;;  %v1440_v31 = vadd.f32 %v2301_v32, %v1439_v47 }
 0x74d   : > { %v1232_v23 = vpop.f32.mrf.mxu2 }
 0x74e   : > { %1729 = vpow2.f32 %v1582_v22  ;;  %1468 = vst [vmem:[%s2306_s6 + $0x40] sm:$0xff] %v1440_v31 }
 0x74f   : > { %v1275_v25 = vpop.f32.mrf.mxu1 }
 0x750   : > { %v1276_v27 = vadd.f32 %v1275_v25, %v1232_v23 }
 0x752   : > { %v1279_v30 = vadd.f32 %v1276_v27, %v2137_v50 }
 0x753   : > { %v1442_v15 = vpop.f32.mrf.mxu3 }
 0x754   : > { %v1730_v24 = vpop.eup %1729  ;;  %1731 = vtanh.f32 %v1279_v30  ;;  %v1443_v34 = vadd.f32 %v2301_v32, %v1442_v15 }
 0x755   : > { %v1283_v9 = vadd.f32 1.0, %v1730_v24  ;;  %v1415_v0 = vpop.f32.mrf.mxu2 }
 0x756   : > { %v1416_v20 = vadd.f32 %v2301_v32, %v1415_v0  ;;  %1469 = vst [vmem:[%s2306_s6 + $0x48] sm:$0xff] %v1443_v34 }
 0x757   : > { %1733 = vrcp.f32 %v1283_v9  ;;  %v1295_v29 = vand.u32 2147483648, %v1283_v9  ;;  %v1293_v52 = vand.u32 2147483647, %v1283_v9  ;;  %vm1289_vm13 = vweird.f32 %v1283_v9 }
 0x758   : > { %1460 = vst [vmem:[%s2306_s6] sm:$0xff] %v1416_v20 }
 0x759   : > { %v1296_v53 = vor.u32 1.1754944e-38, %v1295_v29  ;;  %vm1294_vm15 = vcmp.eq.f32.partialorder %v1293_v52, 8.507059e+37 }
 0x75a   : > { %v1732_v21 = vpop.eup %1731 }
 0x75b   : > { %1301 = vrot.lane.b32.xlu1 %v1732_v21, %s1745_s28  ;;  %v1445_v44 = vpop.f32.mrf.mxu3 }
 0x75c   : > { %v1446_v50 = vadd.f32 %v2301_v32, %v1445_v44 }
 0x75d   : > { %v1734_v40 = vpop.eup %1733  ;;  %v1418_v17 = vpop.f32.mrf.mxu2 }
 0x75e   : > { %v1285_v7 = vmul.f32 %v1734_v40, %v1283_v9  ;;  %v1419_v11 = vadd.f32 %v2301_v32, %v1418_v17  ;;  %1470 = vst [vmem:[%s2306_s6 + $0x50] sm:$0xff] %v1446_v50  ;;  %vm1290_vm12 = vweird.f32 %v1734_v40 }
 0x75f   : > { %vm1291_vm14 = vmor %vm1289_vm13, %vm1290_vm12 }
 0x760   : > { %v1286_v13 = vsub.f32 1.0, %v1285_v7  ;;  %1461 = vst [vmem:[%s2306_s6 + $0x8] sm:$0xff] %v1419_v11 }
 0x762   : > { %v1287_v49 = vmul.f32 %v1734_v40, %v1286_v13 }
 0x763   : > { %v1448_v51 = vpop.f32.mrf.mxu3 }
 0x764   : > { %v1449_v43 = vadd.f32 %v2301_v32, %v1448_v51  ;;  %v1288_v26 = vadd.f32 %v1734_v40, %v1287_v49 }
 0x765   : > { %v1421_v35 = vpop.f32.mrf.mxu2 }
 0x766   : > { %v1422_v54 = vadd.f32 %v2301_v32, %v1421_v35  ;;  %1471 = vst [vmem:[%s2306_s6 + $0x58] sm:$0xff] %v1449_v43  ;;  %v1292_v19 = vsel %vm1291_vm14, %v1734_v40, %v1288_v26 }
 0x767   : > { %v1297_v57 = vsel %vm1294_vm15, %v1296_v53, %v1292_v19 }
 0x768   : > { %1462 = vst [vmem:[%s2306_s6 + $0x10] sm:$0xff] %v1422_v54  ;;  %v1305_v58 = vmul.f32 %v1297_v57, %v1190_v56  ;;  %v1315_v59 = vmul.f32 %v1313_v55, %v1297_v57 }
 0x76a   : > { %1307 = vrot.lane.b32.xlu2 %v1305_v58, %s1745_s28  ;;  %1317 = vrot.lane.b32.xlu0 %v1315_v59, %s1746_s29 }
 0x76b   : > { %v1451_v48 = vpop.f32.mrf.mxu3 }
 0x76c   : > { %v1452_v60 = vadd.f32 %v2301_v32, %v1451_v48 }
 0x76d   : > { %v1424_v61 = vpop.f32.mrf.mxu2 }
 0x76e   : > { %v1425_v62 = vadd.f32 %v2301_v32, %v1424_v61  ;;  %1472 = vst [vmem:[%s2306_s6 + $0x60] sm:$0xff] %v1452_v60 }
 0x770   : > { %1463 = vst [vmem:[%s2306_s6 + $0x18] sm:$0xff] %v1425_v62 }
 0x773   : > { %v1454_v63 = vpop.f32.mrf.mxu3 }
 0x774   : > { %v1455_v33 = vadd.f32 %v2301_v32, %v1454_v63 }
 0x775   : > { %v1427_v1 = vpop.f32.mrf.mxu2 }
 0x776   : > { %v1428_v2 = vadd.f32 %v2301_v32, %v1427_v1  ;;  %1473 = vst [vmem:[%s2306_s6 + $0x68] sm:$0xff] %v1455_v33 }
 0x778   : > { %1464 = vst [vmem:[%s2306_s6 + $0x20] sm:$0xff] %v1428_v2 }
 0x7c4   : > { %v1308_v8 = vpop.permute.xlu2 %1307 }
 0x7cd   : > { %v1302_v3 = vpop.permute.xlu1 %1301 }
 0x7ce   : > { %v1304_v4 = vmul.f32 %v1302_v3, %v1297_v57 }
 0x7d0   : > { %v1310_v5 = vadd.f32 %v1308_v8, %v1304_v4 }
 0x7dc   : > { %v1318_v6 = vpop.permute.xlu0 %1317 }
 0x7dd   : > { %v1320_v10 = vadd.f32 %v1318_v6, %v1310_v5 }
 0x7df   : > { %1735 = vtanh.f32 %v1320_v10  ;;  %1333 = vrot.lane.b32.xlu0 %v1320_v10, %s1745_s28 }
 0x7e5   : > { %v1736_v12 = vpop.eup %1735 }
 0x7e6   : > { %1323 = vrot.lane.b32.xlu1 %v1736_v12, %s1746_s29 }
 0x851   : > { %v1334_v14 = vpop.permute.xlu0 %1333 }
 0x858   : > { %v1324_v18 = vpop.permute.xlu1 %1323 }
 0x859   : > { %v1326_v28 = vmul.f32 %v1324_v18, %v1297_v57 }
 0x85b   : > { %1328 = vrot.lane.b32.xlu2 %v1326_v28, %s1746_s29 }
 0x8b5   : > { %v1329_v16 = vpop.permute.xlu2 %1328 }
 0x8b6   : > { %1331 = vst.msk [vmem:[#allocation2 + $0x70] sm:$0xff] %vm544_vm4, %v1329_v16 }
 0x8bd   : > { %v1351_v36 = vld [vmem:[#allocation2 + $0x70] sm:$0xff] }
 0x8be   : > { %1597 = vmatmul.msk.f32.gmra.mxu3 %vm544_vm4, %v1351_v36 }
 0x941   : > { %v1457_v37 = vpop.f32.mrf.mxu3 }
 0x942   : > { %v1458_v39 = vadd.f32 %v2301_v32, %v1457_v37 }
 0x944   : > { %1474 = vst [vmem:[%s2306_s6 + $0x70] sm:$0xff] %v1458_v39 }
 0x945 PF: > { %s13_s12 = sadd.s32 1, %s1743_s12  }
 0x946   : > { %p10_p5 = scmp.ge.s32.totalorder %s13_s12, 6  }
 0x948   :  { %12 = sbr.rel (!%p10_p5) target bundleno = 1 (0x1), region = 63 }

</bundles_post_ra>
